<compile_context>
chip_gen: v7x
topology: tpu7x:2x2x1
jax: 0.10.0
libtpu: 0.0.40
codegen_flags: <defaults>
</compile_context>

<pallas_src>
import functools

import jax
import jax.numpy as jnp
from jax.experimental import pallas as pl
from jax.experimental.pallas import tpu as pltpu


def _round_up(x, m):
    return (x + m - 1) // m * m


def _cdiv(a, b):
    return -(-a // b)


def _vmem_capacity_bytes():
    """Per-TensorCore VMEM capacity; conservative 64 MiB (v7x) fallback."""
    try:
        cap = getattr(pltpu.get_tpu_info(), "vmem_capacity_bytes", None)
        if cap:
            return int(cap)
    except Exception:
        pass
    return 64 * 1024 * 1024


def _qst_encoder_kernel(num_layers, seq_len, tb, H, HG, G, cdt, *refs):
    # refs: x, [w_ih_t, w_hh_t, bias]*L, fc_w_t, fc_b, out, pre_s, hseq_s
    x_ref = refs[0]
    layer_refs = [refs[1 + 3 * l: 4 + 3 * l] for l in range(num_layers)]
    fc_w_ref = refs[1 + 3 * num_layers]
    fc_b_ref = refs[2 + 3 * num_layers]
    out_ref = refs[3 + 3 * num_layers]
    pre_ref = refs[4 + 3 * num_layers]     # (S, TB, G)  cdt scratch
    hseq_ref = refs[5 + 3 * num_layers]    # (S, TB, H)  cdt scratch

    S, B = seq_len, tb
    EP = out_ref.shape[-1]

    # Packed-gate constants, hoisted out of the recurrence.  Gate order
    # (PyTorch LSTM) is [i, f, g, o]; gate k occupies columns [k*HG, k*HG+H).
    # One tanh over the packed vreg gives all four gate activations:
    # sigmoid(x) == 0.5*tanh(0.5*x)+0.5 for i/f/o, tanh(x) for g.
    col = jax.lax.broadcasted_iota(jnp.int32, (B, G), 1)
    is_g = (col >= 2 * HG) & (col < 2 * HG + H)
    gate_scale = jnp.where(is_g, 1.0, 0.5).astype(jnp.float32)

    fc_w = fc_w_ref[...]                                   # (2*L*H, EP) cdt
    out_acc = jnp.broadcast_to(fc_b_ref[...].astype(jnp.float32), (B, EP))

    for l in range(num_layers):                            # small static loop
        w_ih_t = layer_refs[l][0][...]                     # (in, G) cdt
        w_hh_t = layer_refs[l][1][...]                     # (H,  G) cdt
        bias = layer_refs[l][2][...].astype(jnp.float32)   # (1,  G) f32

        # Hoisted input-to-hidden projection + bias: ONE matmul per layer,
        # off the sequential critical path, stored bf16 to VMEM.
        if l == 0:
            inp = jnp.tanh(x_ref[...].astype(jnp.float32)).astype(cdt)
            inp2d = inp.reshape(S * B, inp.shape[-1])
        else:
            inp2d = hseq_ref[...].reshape(S * B, H)
        pre = jnp.dot(inp2d, w_ih_t, preferred_element_type=jnp.float32) + bias
        pre_ref[...] = pre.reshape(S, B, G).astype(cdt)

        last_layer = l == num_layers - 1

        def step(t, carry, w_hh_t=w_hh_t, last_layer=last_layer):
            h, c = carry                                   # (B, H) f32
            gates = pre_ref[t].astype(jnp.float32) + jnp.dot(
                h.astype(cdt), w_hh_t, preferred_element_type=jnp.float32)
            t_all = jnp.tanh(gates * gate_scale)           # single EUP pass
            act = jnp.where(is_g, t_all, 0.5 * t_all + 0.5)
            i_g = act[:, 0 * HG:0 * HG + H]
            f_g = act[:, 1 * HG:1 * HG + H]
            g_g = act[:, 2 * HG:2 * HG + H]
            o_g = act[:, 3 * HG:3 * HG + H]
            c = f_g * c + i_g * g_g                        # f32 elementwise
            h = o_g * jnp.tanh(c)
            if not last_layer:                             # last layer's h_t
                hseq_ref[t] = h.astype(cdt)                # is never read
            return (h, c)

        h0 = jnp.zeros((B, H), jnp.float32)
        c0 = jnp.zeros((B, H), jnp.float32)
        unroll = S if S <= 16 else 4                       # bound live ranges
        h, c = jax.lax.fori_loop(0, S, step, (h0, c0), unroll=unroll)

        # PyTorch feature layout per row is [h_l0, c_l0, h_l1, c_l1, ...]:
        # fold fc into per-(h, c) matmuls -> no concat / unaligned stores.
        f_h = fc_w[(2 * l + 0) * H:(2 * l + 1) * H, :]
        f_c = fc_w[(2 * l + 1) * H:(2 * l + 2) * H, :]
        out_acc = out_acc + jnp.dot(jnp.tanh(h).astype(cdt), f_h,
                                    preferred_element_type=jnp.float32)
        out_acc = out_acc + jnp.dot(jnp.tanh(c).astype(cdt), f_c,
                                    preferred_element_type=jnp.float32)

    out_ref[...] = out_acc.astype(out_ref.dtype)


def qst_encoder_forward(question, params, *, num_layers, hidden_size, embed_size,
                        compute_dtype=jnp.bfloat16):
    """question: (batch, seq) int32.  Returns (batch, embed_size) float32."""
    emb = params["word2vec"]
    batch, seq_len = question.shape
    word_embed = emb.shape[1]
    H = hidden_size
    cdt = jnp.dtype(compute_dtype)
    isz = cdt.itemsize

    # Gate packing: dense (stride H) when H < 128 or H is lane-aligned, else
    # one 128-aligned block per gate.
    HG = H if (H < 128 or H % 128 == 0) else _round_up(H, 128)
    G = _round_up(4 * HG, 128)
    EP = _round_up(embed_size, 128)            # lane-dense fc output

    # ---- per-generation VMEM budgeting & batch tiling ------------------------
    cap = _vmem_capacity_bytes()
    budget = (cap * 3) // 4                    # ~48 MiB v7x, ~96 MiB v5e/v6e

    def est_vmem_bytes(tb):
        b = seq_len * tb * G * isz                  # pre scratch
        b += seq_len * tb * H * isz                 # hseq scratch
        b += seq_len * tb * G * 4                   # transient f32 projection
        b += seq_len * tb * word_embed * 4          # transient f32 tanh(x)
        b += 2 * seq_len * tb * word_embed * isz    # x block (double buffered)
        b += 2 * tb * EP * 4                        # out block (double buffered)
        wb = 0
        for l in range(num_layers):
            in_dim = word_embed if l == 0 else H
            wb += (in_dim + H) * G * isz + G * 4
        wb += 2 * num_layers * H * EP * isz + EP * 4
        return b + 2 * wb + (6 << 20)               # compiler scratch margin

    B8 = _round_up(batch, 8)
    TB_MAX = 256                                    # fills MXU rows (v6e/v7x)
    nblk = max(1, _cdiv(B8, TB_MAX))
    if B8 >= 16:
        nblk = max(nblk, 2)                         # keep both v7x TCs busy
    while True:
        TB = _round_up(_cdiv(B8, nblk), 8)
        if est_vmem_bytes(TB) <= budget or TB <= 8:
            break
        nblk += 1
    B_pad = nblk * TB
    vmem_limit = int(max(32 << 20, min(budget, est_vmem_bytes(TB))))

    # ---- operand packing (glue) ----------------------------------------------
    x = jnp.take(emb, question, axis=0).astype(jnp.float32)   # (B, S, E) gather
    x = jnp.transpose(x, (1, 0, 2))                            # (S, B, E)
    if B_pad != batch:
        x = jnp.pad(x, ((0, 0), (0, B_pad - batch), (0, 0)))
    x = x.astype(cdt)

    def pack_gate_cols(w):        # (4H, in) PyTorch layout -> (in, G) packed
        wt = w.T.astype(jnp.float32)
        out = jnp.zeros((wt.shape[0], G), jnp.float32)
        for k in range(4):
            out = out.at[:, k * HG:k * HG + H].set(wt[:, k * H:(k + 1) * H])
        return out.astype(cdt)

    rep = lambda b: (0, 0)
    inputs = [x]
    in_specs = [pl.BlockSpec((seq_len, TB, word_embed), lambda b: (0, b, 0))]

    for l in range(num_layers):
        w_ih, w_hh, b_ih, b_hh = params["lstm"][l]
        in_dim = word_embed if l == 0 else H
        w_ih_p = pack_gate_cols(w_ih)                          # (in_dim, G)
        w_hh_p = pack_gate_cols(w_hh)                          # (H, G)
        b = (b_ih + b_hh).astype(jnp.float32)
        b_p = jnp.zeros((G,), jnp.float32)
        for k in range(4):
            b_p = b_p.at[k * HG:k * HG + H].set(b[k * H:(k + 1) * H])
        inputs += [w_ih_p, w_hh_p, b_p[None, :]]
        in_specs += [pl.BlockSpec((in_dim, G), rep),
                     pl.BlockSpec((H, G), rep),
                     pl.BlockSpec((1, G), rep)]

    # fc: rows stay in PyTorch feature order [h_l0, c_l0, ...]; columns padded
    # to a lane-dense EP.  Kernel slices rows per (h, c) piece.
    fc_w_p = jnp.zeros((2 * num_layers * H, EP), jnp.float32)
    fc_w_p = fc_w_p.at[:, :embed_size].set(params["fc_w"].T.astype(jnp.float32))
    fc_b_p = jnp.zeros((EP,), jnp.float32).at[:embed_size].set(params["fc_b"])
    inputs += [fc_w_p.astype(cdt), fc_b_p[None, :]]
    in_specs += [pl.BlockSpec((2 * num_layers * H, EP), rep),
                 pl.BlockSpec((1, EP), rep)]

    kernel = functools.partial(_qst_encoder_kernel, num_layers, seq_len, TB,
                               H, HG, G, cdt)
    out = pl.pallas_call(
        kernel,
        out_shape=jax.ShapeDtypeStruct((B_pad, EP), jnp.float32),
        grid=(B_pad // TB,),
        in_specs=in_specs,
        out_specs=pl.BlockSpec((TB, EP), lambda b: (b, 0)),
        scratch_shapes=[
            pltpu.VMEM((seq_len, TB, G), cdt),   # batched gate pre-activations
            pltpu.VMEM((seq_len, TB, H), cdt),   # per-step h feeding next layer
        ],
        compiler_params=pltpu.CompilerParams(
            dimension_semantics=("parallel",),
            vmem_limit_bytes=vmem_limit,
        ),
    )(*inputs)
    return out[:batch, :embed_size]


def init_params(key, vocab, word_embed, embed_size, num_layers, hidden):
    """Deterministic synthetic parameters matching nn.Embedding/nn.LSTM/nn.Linear shapes."""
    n_keys = 1 + 4 * num_layers + 2
    keys = list(jax.random.split(key, n_keys))
    k = 1.0 / jnp.sqrt(hidden)
    params = {}
    params["word2vec"] = jax.random.normal(keys[0], (vocab, word_embed), jnp.float32)
    lstm = []
    ki = 1
    for l in range(num_layers):
        in_size = word_embed if l == 0 else hidden
        w_ih = jax.random.uniform(keys[ki + 0], (4 * hidden, in_size), jnp.float32, -k, k)
        w_hh = jax.random.uniform(keys[ki + 1], (4 * hidden, hidden), jnp.float32, -k, k)
        b_ih = jax.random.uniform(keys[ki + 2], (4 * hidden,), jnp.float32, -k, k)
        b_hh = jax.random.uniform(keys[ki + 3], (4 * hidden,), jnp.float32, -k, k)
        lstm.append((w_ih, w_hh, b_ih, b_hh))
        ki += 4
    params["lstm"] = lstm
    fan_in = 2 * num_layers * hidden
    kf = 1.0 / jnp.sqrt(fan_in)
    params["fc_w"] = jax.random.uniform(keys[ki], (embed_size, fan_in), jnp.float32, -kf, kf)
    params["fc_b"] = jax.random.uniform(keys[ki + 1], (embed_size,), jnp.float32, -kf, kf)
    return params


def reference_forward(question, params, *, num_layers, hidden_size, embed_size):
    """Pure-JAX mirror of the PyTorch forward, for verification."""
    x = jnp.tanh(jnp.take(params["word2vec"], question, axis=0))  # (B, S, E)
    x = jnp.transpose(x, (1, 0, 2))                                # (S, B, E)
    seq_len, batch, _ = x.shape
    inp = x
    hs, cs = [], []
    H = hidden_size
    for l in range(num_layers):
        w_ih, w_hh, b_ih, b_hh = params["lstm"][l]
        h = jnp.zeros((batch, H), jnp.float32)
        c = jnp.zeros((batch, H), jnp.float32)
        outs = []
        for t in range(seq_len):
            gates = inp[t] @ w_ih.T + h @ w_hh.T + b_ih + b_hh
            i = jax.nn.sigmoid(gates[:, 0 * H:1 * H])
            f = jax.nn.sigmoid(gates[:, 1 * H:2 * H])
            g = jnp.tanh(gates[:, 2 * H:3 * H])
            o = jax.nn.sigmoid(gates[:, 3 * H:4 * H])
            c = f * c + i * g
            h = o * jnp.tanh(c)
            outs.append(h)
        inp = jnp.stack(outs)
        hs.append(h)
        cs.append(c)
    feat = jnp.concatenate(
        [jnp.concatenate([hs[l], cs[l]], axis=1) for l in range(num_layers)], axis=1)
    feat = jnp.tanh(feat)
    return feat @ params["fc_w"].T + params["fc_b"]


if __name__ == "__main__":
    qst_vocab_size = 50
    word_embed_size = 32
    embed_size = 32
    num_layers = 2
    hidden_size = 32
    batch, seq = 2, 8

    key = jax.random.PRNGKey(0)
    kp, kq = jax.random.split(key)
    params = init_params(kp, qst_vocab_size, word_embed_size, embed_size,
                         num_layers, hidden_size)
    question = jax.random.randint(kq, (batch, seq), 0, qst_vocab_size, dtype=jnp.int32)

    ref = reference_forward(question, params, num_layers=num_layers,
                            hidden_size=hidden_size, embed_size=embed_size)

    # f32 compute path: verifies the kernel algorithm tightly.
    out_f32 = qst_encoder_forward(question, params, num_layers=num_layers,
                                  hidden_size=hidden_size, embed_size=embed_size,
                                  compute_dtype=jnp.float32)
    out_f32 = jax.block_until_ready(out_f32)
    assert out_f32.shape == (batch, embed_size), out_f32.shape
    assert bool(jnp.all(jnp.isfinite(out_f32)))
    assert bool(jnp.allclose(out_f32, ref, atol=1e-3, rtol=1e-3)), (
        "f32 mismatch, max abs err = %g" % float(jnp.max(jnp.abs(out_f32 - ref))))

    # bf16 compute path (default perf config): looser tolerance for rounding.
    out_bf16 = qst_encoder_forward(question, params, num_layers=num_layers,
                                   hidden_size=hidden_size, embed_size=embed_size)
    out_bf16 = jax.block_until_ready(out_bf16)
    assert out_bf16.shape == (batch, embed_size), out_bf16.shape
    assert bool(jnp.all(jnp.isfinite(out_bf16)))
    assert bool(jnp.allclose(out_bf16, ref, atol=3e-2, rtol=3e-2)), (
        "bf16 mismatch, max abs err = %g" % float(jnp.max(jnp.abs(out_bf16 - ref))))

    print("KERNEL_OK")
</pallas_src>

<mosaic_0001>
module attributes {stable_mosaic.version = 11 : i64} {
  func.func @_qst_encoder_kernel(%arg0: i32, %arg1: memref<8x8x32xf32, #tpu.memory_space<vmem>>, %arg2: memref<32x128xf32, #tpu.memory_space<vmem>>, %arg3: memref<32x128xf32, #tpu.memory_space<vmem>>, %arg4: memref<1x128xf32, #tpu.memory_space<vmem>>, %arg5: memref<32x128xf32, #tpu.memory_space<vmem>>, %arg6: memref<32x128xf32, #tpu.memory_space<vmem>>, %arg7: memref<1x128xf32, #tpu.memory_space<vmem>>, %arg8: memref<128x128xf32, #tpu.memory_space<vmem>>, %arg9: memref<1x128xf32, #tpu.memory_space<vmem>>, %arg10: memref<8x128xf32, #tpu.memory_space<vmem>>, %arg11: memref<8x8x128xf32, #tpu.memory_space<vmem>>, %arg12: memref<8x8x32xf32, #tpu.memory_space<vmem>>) attributes {dimension_semantics = [#tpu.dimension_semantics<parallel>], iteration_bounds = array<i64: 1>, scalar_prefetch = 0 : i64, scratch_operands = 2 : i64, tpu.core_type = #tpu.core_type<tc>, window_params = [{transform_indices = @transform_0, window_bounds = array<i64: 8, 8, 32>}, {pipeline_mode = #tpu.pipeline_mode<synchronous>, transform_indices = @transform_1, window_bounds = array<i64: 32, 128>}, {pipeline_mode = #tpu.pipeline_mode<synchronous>, transform_indices = @transform_2, window_bounds = array<i64: 32, 128>}, {pipeline_mode = #tpu.pipeline_mode<synchronous>, transform_indices = @transform_3, window_bounds = array<i64: 1, 128>}, {pipeline_mode = #tpu.pipeline_mode<synchronous>, transform_indices = @transform_4, window_bounds = array<i64: 32, 128>}, {pipeline_mode = #tpu.pipeline_mode<synchronous>, transform_indices = @transform_5, window_bounds = array<i64: 32, 128>}, {pipeline_mode = #tpu.pipeline_mode<synchronous>, transform_indices = @transform_6, window_bounds = array<i64: 1, 128>}, {pipeline_mode = #tpu.pipeline_mode<synchronous>, transform_indices = @transform_7, window_bounds = array<i64: 128, 128>}, {pipeline_mode = #tpu.pipeline_mode<synchronous>, transform_indices = @transform_8, window_bounds = array<i64: 1, 128>}, {transform_indices = @transform_9, window_bounds = array<i64: 8, 128>}]} {
    %0 = tpu.iota {dimensions = array<i32: 1>} : vector<8x128xi32>
    %c64_i32 = arith.constant 64 : i32
    %1 = vector.broadcast %c64_i32 : i32 to vector<8x128xi32>
    %2 = arith.cmpi sge, %0, %1 : vector<8x128xi32>
    %c96_i32 = arith.constant 96 : i32
    %3 = vector.broadcast %c96_i32 : i32 to vector<8x128xi32>
    %4 = arith.cmpi slt, %0, %3 : vector<8x128xi32>
    %5 = arith.andi %2, %4 : vector<8x128xi1>
    %cst = arith.constant 1.000000e+00 : f32
    %cst_0 = arith.constant 5.000000e-01 : f32
    %6 = vector.broadcast %cst : f32 to vector<8x128xf32>
    %7 = vector.broadcast %cst_0 : f32 to vector<8x128xf32>
    %8 = arith.select %5, %6, %7 : vector<8x128xi1>, vector<8x128xf32>
    %c0 = arith.constant 0 : index
    %c0_1 = arith.constant 0 : index
    %9 = vector.load %arg8[%c0, %c0_1] : memref<128x128xf32, #tpu.memory_space<vmem>>, vector<128x128xf32>
    %c0_2 = arith.constant 0 : index
    %c0_3 = arith.constant 0 : index
    %10 = vector.load %arg9[%c0_2, %c0_3] : memref<1x128xf32, #tpu.memory_space<vmem>>, vector<1x128xf32>
    %11 = vector.shape_cast %10 : vector<1x128xf32> to vector<1x128xf32>
    %12 = vector.broadcast %11 : vector<1x128xf32> to vector<8x128xf32>
    %c0_4 = arith.constant 0 : index
    %c0_5 = arith.constant 0 : index
    %13 = vector.load %arg2[%c0_4, %c0_5] : memref<32x128xf32, #tpu.memory_space<vmem>>, vector<32x128xf32>
    %c0_6 = arith.constant 0 : index
    %c0_7 = arith.constant 0 : index
    %14 = vector.load %arg3[%c0_6, %c0_7] : memref<32x128xf32, #tpu.memory_space<vmem>>, vector<32x128xf32>
    %c0_8 = arith.constant 0 : index
    %c0_9 = arith.constant 0 : index
    %15 = vector.load %arg4[%c0_8, %c0_9] : memref<1x128xf32, #tpu.memory_space<vmem>>, vector<1x128xf32>
    %c0_10 = arith.constant 0 : index
    %c0_11 = arith.constant 0 : index
    %c0_12 = arith.constant 0 : index
    %16 = vector.load %arg1[%c0_10, %c0_11, %c0_12] : memref<8x8x32xf32, #tpu.memory_space<vmem>>, vector<8x8x32xf32>
    %17 = math.tanh %16 : vector<8x8x32xf32>
    %18 = vector.shape_cast %17 : vector<8x8x32xf32> to vector<64x32xf32>
    %cst_13 = arith.constant dense<0.000000e+00> : vector<64x128xf32>
    %19 = tpu.matmul %18, %13, %cst_13 {dimension_numbers = #tpu.dot_dimension_numbers<[1], [0], [0], [1], [0, 0, 1, 1], [], []>} : vector<64x32xf32>, vector<32x128xf32>, vector<64x128xf32> -> vector<64x128xf32>
    %20 = vector.broadcast %15 : vector<1x128xf32> to vector<64x128xf32>
    %21 = arith.addf %19, %20 : vector<64x128xf32>
    %22 = vector.shape_cast %21 : vector<64x128xf32> to vector<8x8x128xf32>
    %c0_14 = arith.constant 0 : index
    %c0_15 = arith.constant 0 : index
    %c0_16 = arith.constant 0 : index
    %23 = vector.load %arg11[%c0_14, %c0_15, %c0_16] : memref<8x8x128xf32, #tpu.memory_space<vmem>>, vector<8x8x128xf32>
    tpu.vector_store %arg11[%c0_14, %c0_15, %c0_16], %22 {strides = array<i32>} : memref<8x8x128xf32, #tpu.memory_space<vmem>>, vector<8x8x128xf32>,
    %cst_17 = arith.constant 0.000000e+00 : f32
    %24 = vector.broadcast %cst_17 : f32 to vector<8x32xf32>
    %cst_18 = arith.constant 0.000000e+00 : f32
    %25 = vector.broadcast %cst_18 : f32 to vector<8x32xf32>
    %c0_i32 = arith.constant 0 : i32
    %26 = arith.index_cast %c0_i32 : i32 to index
    %c0_19 = arith.constant 0 : index
    %c0_20 = arith.constant 0 : index
    %27 = vector.load %arg11[%26, %c0_19, %c0_20] : memref<8x8x128xf32, #tpu.memory_space<vmem>>, vector<1x8x128xf32>
    %28 = vector.shape_cast %27 : vector<1x8x128xf32> to vector<8x128xf32>
    %cst_21 = arith.constant dense<0.000000e+00> : vector<8x128xf32>
    %29 = tpu.matmul %24, %14, %cst_21 {dimension_numbers = #tpu.dot_dimension_numbers<[1], [0], [0], [1], [0, 0, 1, 1], [], []>} : vector<8x32xf32>, vector<32x128xf32>, vector<8x128xf32> -> vector<8x128xf32>
    %30 = arith.addf %28, %29 : vector<8x128xf32>
    %31 = arith.mulf %30, %8 : vector<8x128xf32>
    %32 = math.tanh %31 : vector<8x128xf32>
    %cst_22 = arith.constant 5.000000e-01 : f32
    %33 = vector.broadcast %cst_22 : f32 to vector<8x128xf32>
    %34 = arith.mulf %33, %32 : vector<8x128xf32>
    %cst_23 = arith.constant 5.000000e-01 : f32
    %35 = vector.broadcast %cst_23 : f32 to vector<8x128xf32>
    %36 = arith.addf %34, %35 : vector<8x128xf32>
    %37 = arith.select %5, %32, %36 : vector<8x128xi1>, vector<8x128xf32>
    %38 = vector.extract_strided_slice %37 {offsets = [0, 0], sizes = [8, 32], strides = [1, 1]} : vector<8x128xf32> to vector<8x32xf32>
    %39 = vector.extract_strided_slice %37 {offsets = [0, 32], sizes = [8, 32], strides = [1, 1]} : vector<8x128xf32> to vector<8x32xf32>
    %40 = vector.extract_strided_slice %37 {offsets = [0, 64], sizes = [8, 32], strides = [1, 1]} : vector<8x128xf32> to vector<8x32xf32>
    %41 = vector.extract_strided_slice %37 {offsets = [0, 96], sizes = [8, 32], strides = [1, 1]} : vector<8x128xf32> to vector<8x32xf32>
    %42 = arith.mulf %39, %25 : vector<8x32xf32>
    %43 = arith.mulf %38, %40 : vector<8x32xf32>
    %44 = arith.addf %42, %43 : vector<8x32xf32>
    %45 = math.tanh %44 : vector<8x32xf32>
    %46 = arith.mulf %41, %45 : vector<8x32xf32>
    %47 = arith.index_cast %c0_i32 : i32 to index
    %c0_24 = arith.constant 0 : index
    %c0_25 = arith.constant 0 : index
    %48 = vector.load %arg12[%47, %c0_24, %c0_25] : memref<8x8x32xf32, #tpu.memory_space<vmem>>, vector<1x8x32xf32>
    %49 = vector.shape_cast %48 : vector<1x8x32xf32> to vector<8x32xf32>
    %50 = vector.shape_cast %46 : vector<8x32xf32> to vector<1x8x32xf32>
    tpu.vector_store %arg12[%47, %c0_24, %c0_25], %50 {strides = array<i32>} : memref<8x8x32xf32, #tpu.memory_space<vmem>>, vector<1x8x32xf32>,
    %c1_i32 = arith.constant 1 : i32
    %51 = arith.index_cast %c1_i32 : i32 to index
    %c0_26 = arith.constant 0 : index
    %c0_27 = arith.constant 0 : index
    %52 = vector.load %arg11[%51, %c0_26, %c0_27] : memref<8x8x128xf32, #tpu.memory_space<vmem>>, vector<1x8x128xf32>
    %53 = vector.shape_cast %52 : vector<1x8x128xf32> to vector<8x128xf32>
    %cst_28 = arith.constant dense<0.000000e+00> : vector<8x128xf32>
    %54 = tpu.matmul %46, %14, %cst_28 {dimension_numbers = #tpu.dot_dimension_numbers<[1], [0], [0], [1], [0, 0, 1, 1], [], []>} : vector<8x32xf32>, vector<32x128xf32>, vector<8x128xf32> -> vector<8x128xf32>
    %55 = arith.addf %53, %54 : vector<8x128xf32>
    %56 = arith.mulf %55, %8 : vector<8x128xf32>
    %57 = math.tanh %56 : vector<8x128xf32>
    %cst_29 = arith.constant 5.000000e-01 : f32
    %58 = vector.broadcast %cst_29 : f32 to vector<8x128xf32>
    %59 = arith.mulf %58, %57 : vector<8x128xf32>
    %cst_30 = arith.constant 5.000000e-01 : f32
    %60 = vector.broadcast %cst_30 : f32 to vector<8x128xf32>
    %61 = arith.addf %59, %60 : vector<8x128xf32>
    %62 = arith.select %5, %57, %61 : vector<8x128xi1>, vector<8x128xf32>
    %63 = vector.extract_strided_slice %62 {offsets = [0, 0], sizes = [8, 32], strides = [1, 1]} : vector<8x128xf32> to vector<8x32xf32>
    %64 = vector.extract_strided_slice %62 {offsets = [0, 32], sizes = [8, 32], strides = [1, 1]} : vector<8x128xf32> to vector<8x32xf32>
    %65 = vector.extract_strided_slice %62 {offsets = [0, 64], sizes = [8, 32], strides = [1, 1]} : vector<8x128xf32> to vector<8x32xf32>
    %66 = vector.extract_strided_slice %62 {offsets = [0, 96], sizes = [8, 32], strides = [1, 1]} : vector<8x128xf32> to vector<8x32xf32>
    %67 = arith.mulf %64, %44 : vector<8x32xf32>
    %68 = arith.mulf %63, %65 : vector<8x32xf32>
    %69 = arith.addf %67, %68 : vector<8x32xf32>
    %70 = math.tanh %69 : vector<8x32xf32>
    %71 = arith.mulf %66, %70 : vector<8x32xf32>
    %72 = arith.index_cast %c1_i32 : i32 to index
    %c0_31 = arith.constant 0 : index
    %c0_32 = arith.constant 0 : index
    %73 = vector.load %arg12[%72, %c0_31, %c0_32] : memref<8x8x32xf32, #tpu.memory_space<vmem>>, vector<1x8x32xf32>
    %74 = vector.shape_cast %73 : vector<1x8x32xf32> to vector<8x32xf32>
    %75 = vector.shape_cast %71 : vector<8x32xf32> to vector<1x8x32xf32>
    tpu.vector_store %arg12[%72, %c0_31, %c0_32], %75 {strides = array<i32>} : memref<8x8x32xf32, #tpu.memory_space<vmem>>, vector<1x8x32xf32>,
    %c2_i32 = arith.constant 2 : i32
    %76 = arith.index_cast %c2_i32 : i32 to index
    %c0_33 = arith.constant 0 : index
    %c0_34 = arith.constant 0 : index
    %77 = vector.load %arg11[%76, %c0_33, %c0_34] : memref<8x8x128xf32, #tpu.memory_space<vmem>>, vector<1x8x128xf32>
    %78 = vector.shape_cast %77 : vector<1x8x128xf32> to vector<8x128xf32>
    %cst_35 = arith.constant dense<0.000000e+00> : vector<8x128xf32>
    %79 = tpu.matmul %71, %14, %cst_35 {dimension_numbers = #tpu.dot_dimension_numbers<[1], [0], [0], [1], [0, 0, 1, 1], [], []>} : vector<8x32xf32>, vector<32x128xf32>, vector<8x128xf32> -> vector<8x128xf32>
    %80 = arith.addf %78, %79 : vector<8x128xf32>
    %81 = arith.mulf %80, %8 : vector<8x128xf32>
    %82 = math.tanh %81 : vector<8x128xf32>
    %cst_36 = arith.constant 5.000000e-01 : f32
    %83 = vector.broadcast %cst_36 : f32 to vector<8x128xf32>
    %84 = arith.mulf %83, %82 : vector<8x128xf32>
    %cst_37 = arith.constant 5.000000e-01 : f32
    %85 = vector.broadcast %cst_37 : f32 to vector<8x128xf32>
    %86 = arith.addf %84, %85 : vector<8x128xf32>
    %87 = arith.select %5, %82, %86 : vector<8x128xi1>, vector<8x128xf32>
    %88 = vector.extract_strided_slice %87 {offsets = [0, 0], sizes = [8, 32], strides = [1, 1]} : vector<8x128xf32> to vector<8x32xf32>
    %89 = vector.extract_strided_slice %87 {offsets = [0, 32], sizes = [8, 32], strides = [1, 1]} : vector<8x128xf32> to vector<8x32xf32>
    %90 = vector.extract_strided_slice %87 {offsets = [0, 64], sizes = [8, 32], strides = [1, 1]} : vector<8x128xf32> to vector<8x32xf32>
    %91 = vector.extract_strided_slice %87 {offsets = [0, 96], sizes = [8, 32], strides = [1, 1]} : vector<8x128xf32> to vector<8x32xf32>
    %92 = arith.mulf %89, %69 : vector<8x32xf32>
    %93 = arith.mulf %88, %90 : vector<8x32xf32>
    %94 = arith.addf %92, %93 : vector<8x32xf32>
    %95 = math.tanh %94 : vector<8x32xf32>
    %96 = arith.mulf %91, %95 : vector<8x32xf32>
    %97 = arith.index_cast %c2_i32 : i32 to index
    %c0_38 = arith.constant 0 : index
    %c0_39 = arith.constant 0 : index
    %98 = vector.load %arg12[%97, %c0_38, %c0_39] : memref<8x8x32xf32, #tpu.memory_space<vmem>>, vector<1x8x32xf32>
    %99 = vector.shape_cast %98 : vector<1x8x32xf32> to vector<8x32xf32>
    %100 = vector.shape_cast %96 : vector<8x32xf32> to vector<1x8x32xf32>
    tpu.vector_store %arg12[%97, %c0_38, %c0_39], %100 {strides = array<i32>} : memref<8x8x32xf32, #tpu.memory_space<vmem>>, vector<1x8x32xf32>,
    %c3_i32 = arith.constant 3 : i32
    %101 = arith.index_cast %c3_i32 : i32 to index
    %c0_40 = arith.constant 0 : index
    %c0_41 = arith.constant 0 : index
    %102 = vector.load %arg11[%101, %c0_40, %c0_41] : memref<8x8x128xf32, #tpu.memory_space<vmem>>, vector<1x8x128xf32>
    %103 = vector.shape_cast %102 : vector<1x8x128xf32> to vector<8x128xf32>
    %cst_42 = arith.constant dense<0.000000e+00> : vector<8x128xf32>
    %104 = tpu.matmul %96, %14, %cst_42 {dimension_numbers = #tpu.dot_dimension_numbers<[1], [0], [0], [1], [0, 0, 1, 1], [], []>} : vector<8x32xf32>, vector<32x128xf32>, vector<8x128xf32> -> vector<8x128xf32>
    %105 = arith.addf %103, %104 : vector<8x128xf32>
    %106 = arith.mulf %105, %8 : vector<8x128xf32>
    %107 = math.tanh %106 : vector<8x128xf32>
    %cst_43 = arith.constant 5.000000e-01 : f32
    %108 = vector.broadcast %cst_43 : f32 to vector<8x128xf32>
    %109 = arith.mulf %108, %107 : vector<8x128xf32>
    %cst_44 = arith.constant 5.000000e-01 : f32
    %110 = vector.broadcast %cst_44 : f32 to vector<8x128xf32>
    %111 = arith.addf %109, %110 : vector<8x128xf32>
    %112 = arith.select %5, %107, %111 : vector<8x128xi1>, vector<8x128xf32>
    %113 = vector.extract_strided_slice %112 {offsets = [0, 0], sizes = [8, 32], strides = [1, 1]} : vector<8x128xf32> to vector<8x32xf32>
    %114 = vector.extract_strided_slice %112 {offsets = [0, 32], sizes = [8, 32], strides = [1, 1]} : vector<8x128xf32> to vector<8x32xf32>
    %115 = vector.extract_strided_slice %112 {offsets = [0, 64], sizes = [8, 32], strides = [1, 1]} : vector<8x128xf32> to vector<8x32xf32>
    %116 = vector.extract_strided_slice %112 {offsets = [0, 96], sizes = [8, 32], strides = [1, 1]} : vector<8x128xf32> to vector<8x32xf32>
    %117 = arith.mulf %114, %94 : vector<8x32xf32>
    %118 = arith.mulf %113, %115 : vector<8x32xf32>
    %119 = arith.addf %117, %118 : vector<8x32xf32>
    %120 = math.tanh %119 : vector<8x32xf32>
    %121 = arith.mulf %116, %120 : vector<8x32xf32>
    %122 = arith.index_cast %c3_i32 : i32 to index
    %c0_45 = arith.constant 0 : index
    %c0_46 = arith.constant 0 : index
    %123 = vector.load %arg12[%122, %c0_45, %c0_46] : memref<8x8x32xf32, #tpu.memory_space<vmem>>, vector<1x8x32xf32>
    %124 = vector.shape_cast %123 : vector<1x8x32xf32> to vector<8x32xf32>
    %125 = vector.shape_cast %121 : vector<8x32xf32> to vector<1x8x32xf32>
    tpu.vector_store %arg12[%122, %c0_45, %c0_46], %125 {strides = array<i32>} : memref<8x8x32xf32, #tpu.memory_space<vmem>>, vector<1x8x32xf32>,
    %c4_i32 = arith.constant 4 : i32
    %126 = arith.index_cast %c4_i32 : i32 to index
    %c0_47 = arith.constant 0 : index
    %c0_48 = arith.constant 0 : index
    %127 = vector.load %arg11[%126, %c0_47, %c0_48] : memref<8x8x128xf32, #tpu.memory_space<vmem>>, vector<1x8x128xf32>
    %128 = vector.shape_cast %127 : vector<1x8x128xf32> to vector<8x128xf32>
    %cst_49 = arith.constant dense<0.000000e+00> : vector<8x128xf32>
    %129 = tpu.matmul %121, %14, %cst_49 {dimension_numbers = #tpu.dot_dimension_numbers<[1], [0], [0], [1], [0, 0, 1, 1], [], []>} : vector<8x32xf32>, vector<32x128xf32>, vector<8x128xf32> -> vector<8x128xf32>
    %130 = arith.addf %128, %129 : vector<8x128xf32>
    %131 = arith.mulf %130, %8 : vector<8x128xf32>
    %132 = math.tanh %131 : vector<8x128xf32>
    %cst_50 = arith.constant 5.000000e-01 : f32
    %133 = vector.broadcast %cst_50 : f32 to vector<8x128xf32>
    %134 = arith.mulf %133, %132 : vector<8x128xf32>
    %cst_51 = arith.constant 5.000000e-01 : f32
    %135 = vector.broadcast %cst_51 : f32 to vector<8x128xf32>
    %136 = arith.addf %134, %135 : vector<8x128xf32>
    %137 = arith.select %5, %132, %136 : vector<8x128xi1>, vector<8x128xf32>
    %138 = vector.extract_strided_slice %137 {offsets = [0, 0], sizes = [8, 32], strides = [1, 1]} : vector<8x128xf32> to vector<8x32xf32>
    %139 = vector.extract_strided_slice %137 {offsets = [0, 32], sizes = [8, 32], strides = [1, 1]} : vector<8x128xf32> to vector<8x32xf32>
    %140 = vector.extract_strided_slice %137 {offsets = [0, 64], sizes = [8, 32], strides = [1, 1]} : vector<8x128xf32> to vector<8x32xf32>
    %141 = vector.extract_strided_slice %137 {offsets = [0, 96], sizes = [8, 32], strides = [1, 1]} : vector<8x128xf32> to vector<8x32xf32>
    %142 = arith.mulf %139, %119 : vector<8x32xf32>
    %143 = arith.mulf %138, %140 : vector<8x32xf32>
    %144 = arith.addf %142, %143 : vector<8x32xf32>
    %145 = math.tanh %144 : vector<8x32xf32>
    %146 = arith.mulf %141, %145 : vector<8x32xf32>
    %147 = arith.index_cast %c4_i32 : i32 to index
    %c0_52 = arith.constant 0 : index
    %c0_53 = arith.constant 0 : index
    %148 = vector.load %arg12[%147, %c0_52, %c0_53] : memref<8x8x32xf32, #tpu.memory_space<vmem>>, vector<1x8x32xf32>
    %149 = vector.shape_cast %148 : vector<1x8x32xf32> to vector<8x32xf32>
    %150 = vector.shape_cast %146 : vector<8x32xf32> to vector<1x8x32xf32>
    tpu.vector_store %arg12[%147, %c0_52, %c0_53], %150 {strides = array<i32>} : memref<8x8x32xf32, #tpu.memory_space<vmem>>, vector<1x8x32xf32>,
    %c5_i32 = arith.constant 5 : i32
    %151 = arith.index_cast %c5_i32 : i32 to index
    %c0_54 = arith.constant 0 : index
    %c0_55 = arith.constant 0 : index
    %152 = vector.load %arg11[%151, %c0_54, %c0_55] : memref<8x8x128xf32, #tpu.memory_space<vmem>>, vector<1x8x128xf32>
    %153 = vector.shape_cast %152 : vector<1x8x128xf32> to vector<8x128xf32>
    %cst_56 = arith.constant dense<0.000000e+00> : vector<8x128xf32>
    %154 = tpu.matmul %146, %14, %cst_56 {dimension_numbers = #tpu.dot_dimension_numbers<[1], [0], [0], [1], [0, 0, 1, 1], [], []>} : vector<8x32xf32>, vector<32x128xf32>, vector<8x128xf32> -> vector<8x128xf32>
    %155 = arith.addf %153, %154 : vector<8x128xf32>
    %156 = arith.mulf %155, %8 : vector<8x128xf32>
    %157 = math.tanh %156 : vector<8x128xf32>
    %cst_57 = arith.constant 5.000000e-01 : f32
    %158 = vector.broadcast %cst_57 : f32 to vector<8x128xf32>
    %159 = arith.mulf %158, %157 : vector<8x128xf32>
    %cst_58 = arith.constant 5.000000e-01 : f32
    %160 = vector.broadcast %cst_58 : f32 to vector<8x128xf32>
    %161 = arith.addf %159, %160 : vector<8x128xf32>
    %162 = arith.select %5, %157, %161 : vector<8x128xi1>, vector<8x128xf32>
    %163 = vector.extract_strided_slice %162 {offsets = [0, 0], sizes = [8, 32], strides = [1, 1]} : vector<8x128xf32> to vector<8x32xf32>
    %164 = vector.extract_strided_slice %162 {offsets = [0, 32], sizes = [8, 32], strides = [1, 1]} : vector<8x128xf32> to vector<8x32xf32>
    %165 = vector.extract_strided_slice %162 {offsets = [0, 64], sizes = [8, 32], strides = [1, 1]} : vector<8x128xf32> to vector<8x32xf32>
    %166 = vector.extract_strided_slice %162 {offsets = [0, 96], sizes = [8, 32], strides = [1, 1]} : vector<8x128xf32> to vector<8x32xf32>
    %167 = arith.mulf %164, %144 : vector<8x32xf32>
    %168 = arith.mulf %163, %165 : vector<8x32xf32>
    %169 = arith.addf %167, %168 : vector<8x32xf32>
    %170 = math.tanh %169 : vector<8x32xf32>
    %171 = arith.mulf %166, %170 : vector<8x32xf32>
    %172 = arith.index_cast %c5_i32 : i32 to index
    %c0_59 = arith.constant 0 : index
    %c0_60 = arith.constant 0 : index
    %173 = vector.load %arg12[%172, %c0_59, %c0_60] : memref<8x8x32xf32, #tpu.memory_space<vmem>>, vector<1x8x32xf32>
    %174 = vector.shape_cast %173 : vector<1x8x32xf32> to vector<8x32xf32>
    %175 = vector.shape_cast %171 : vector<8x32xf32> to vector<1x8x32xf32>
    tpu.vector_store %arg12[%172, %c0_59, %c0_60], %175 {strides = array<i32>} : memref<8x8x32xf32, #tpu.memory_space<vmem>>, vector<1x8x32xf32>,
    %c6_i32 = arith.constant 6 : i32
    %176 = arith.index_cast %c6_i32 : i32 to index
    %c0_61 = arith.constant 0 : index
    %c0_62 = arith.constant 0 : index
    %177 = vector.load %arg11[%176, %c0_61, %c0_62] : memref<8x8x128xf32, #tpu.memory_space<vmem>>, vector<1x8x128xf32>
    %178 = vector.shape_cast %177 : vector<1x8x128xf32> to vector<8x128xf32>
    %cst_63 = arith.constant dense<0.000000e+00> : vector<8x128xf32>
    %179 = tpu.matmul %171, %14, %cst_63 {dimension_numbers = #tpu.dot_dimension_numbers<[1], [0], [0], [1], [0, 0, 1, 1], [], []>} : vector<8x32xf32>, vector<32x128xf32>, vector<8x128xf32> -> vector<8x128xf32>
    %180 = arith.addf %178, %179 : vector<8x128xf32>
    %181 = arith.mulf %180, %8 : vector<8x128xf32>
    %182 = math.tanh %181 : vector<8x128xf32>
    %cst_64 = arith.constant 5.000000e-01 : f32
    %183 = vector.broadcast %cst_64 : f32 to vector<8x128xf32>
    %184 = arith.mulf %183, %182 : vector<8x128xf32>
    %cst_65 = arith.constant 5.000000e-01 : f32
    %185 = vector.broadcast %cst_65 : f32 to vector<8x128xf32>
    %186 = arith.addf %184, %185 : vector<8x128xf32>
    %187 = arith.select %5, %182, %186 : vector<8x128xi1>, vector<8x128xf32>
    %188 = vector.extract_strided_slice %187 {offsets = [0, 0], sizes = [8, 32], strides = [1, 1]} : vector<8x128xf32> to vector<8x32xf32>
    %189 = vector.extract_strided_slice %187 {offsets = [0, 32], sizes = [8, 32], strides = [1, 1]} : vector<8x128xf32> to vector<8x32xf32>
    %190 = vector.extract_strided_slice %187 {offsets = [0, 64], sizes = [8, 32], strides = [1, 1]} : vector<8x128xf32> to vector<8x32xf32>
    %191 = vector.extract_strided_slice %187 {offsets = [0, 96], sizes = [8, 32], strides = [1, 1]} : vector<8x128xf32> to vector<8x32xf32>
    %192 = arith.mulf %189, %169 : vector<8x32xf32>
    %193 = arith.mulf %188, %190 : vector<8x32xf32>
    %194 = arith.addf %192, %193 : vector<8x32xf32>
    %195 = math.tanh %194 : vector<8x32xf32>
    %196 = arith.mulf %191, %195 : vector<8x32xf32>
    %197 = arith.index_cast %c6_i32 : i32 to index
    %c0_66 = arith.constant 0 : index
    %c0_67 = arith.constant 0 : index
    %198 = vector.load %arg12[%197, %c0_66, %c0_67] : memref<8x8x32xf32, #tpu.memory_space<vmem>>, vector<1x8x32xf32>
    %199 = vector.shape_cast %198 : vector<1x8x32xf32> to vector<8x32xf32>
    %200 = vector.shape_cast %196 : vector<8x32xf32> to vector<1x8x32xf32>
    tpu.vector_store %arg12[%197, %c0_66, %c0_67], %200 {strides = array<i32>} : memref<8x8x32xf32, #tpu.memory_space<vmem>>, vector<1x8x32xf32>,
    %c7_i32 = arith.constant 7 : i32
    %201 = arith.index_cast %c7_i32 : i32 to index
    %c0_68 = arith.constant 0 : index
    %c0_69 = arith.constant 0 : index
    %202 = vector.load %arg11[%201, %c0_68, %c0_69] : memref<8x8x128xf32, #tpu.memory_space<vmem>>, vector<1x8x128xf32>
    %203 = vector.shape_cast %202 : vector<1x8x128xf32> to vector<8x128xf32>
    %cst_70 = arith.constant dense<0.000000e+00> : vector<8x128xf32>
    %204 = tpu.matmul %196, %14, %cst_70 {dimension_numbers = #tpu.dot_dimension_numbers<[1], [0], [0], [1], [0, 0, 1, 1], [], []>} : vector<8x32xf32>, vector<32x128xf32>, vector<8x128xf32> -> vector<8x128xf32>
    %205 = arith.addf %203, %204 : vector<8x128xf32>
    %206 = arith.mulf %205, %8 : vector<8x128xf32>
    %207 = math.tanh %206 : vector<8x128xf32>
    %cst_71 = arith.constant 5.000000e-01 : f32
    %208 = vector.broadcast %cst_71 : f32 to vector<8x128xf32>
    %209 = arith.mulf %208, %207 : vector<8x128xf32>
    %cst_72 = arith.constant 5.000000e-01 : f32
    %210 = vector.broadcast %cst_72 : f32 to vector<8x128xf32>
    %211 = arith.addf %209, %210 : vector<8x128xf32>
    %212 = arith.select %5, %207, %211 : vector<8x128xi1>, vector<8x128xf32>
    %213 = vector.extract_strided_slice %212 {offsets = [0, 0], sizes = [8, 32], strides = [1, 1]} : vector<8x128xf32> to vector<8x32xf32>
    %214 = vector.extract_strided_slice %212 {offsets = [0, 32], sizes = [8, 32], strides = [1, 1]} : vector<8x128xf32> to vector<8x32xf32>
    %215 = vector.extract_strided_slice %212 {offsets = [0, 64], sizes = [8, 32], strides = [1, 1]} : vector<8x128xf32> to vector<8x32xf32>
    %216 = vector.extract_strided_slice %212 {offsets = [0, 96], sizes = [8, 32], strides = [1, 1]} : vector<8x128xf32> to vector<8x32xf32>
    %217 = arith.mulf %214, %194 : vector<8x32xf32>
    %218 = arith.mulf %213, %215 : vector<8x32xf32>
    %219 = arith.addf %217, %218 : vector<8x32xf32>
    %220 = math.tanh %219 : vector<8x32xf32>
    %221 = arith.mulf %216, %220 : vector<8x32xf32>
    %222 = arith.index_cast %c7_i32 : i32 to index
    %c0_73 = arith.constant 0 : index
    %c0_74 = arith.constant 0 : index
    %223 = vector.load %arg12[%222, %c0_73, %c0_74] : memref<8x8x32xf32, #tpu.memory_space<vmem>>, vector<1x8x32xf32>
    %224 = vector.shape_cast %223 : vector<1x8x32xf32> to vector<8x32xf32>
    %225 = vector.shape_cast %221 : vector<8x32xf32> to vector<1x8x32xf32>
    tpu.vector_store %arg12[%222, %c0_73, %c0_74], %225 {strides = array<i32>} : memref<8x8x32xf32, #tpu.memory_space<vmem>>, vector<1x8x32xf32>,
    %c8_i32 = arith.constant 8 : i32
    %226 = vector.extract_strided_slice %9 {offsets = [0, 0], sizes = [32, 128], strides = [1, 1]} : vector<128x128xf32> to vector<32x128xf32>
    %227 = vector.extract_strided_slice %9 {offsets = [32, 0], sizes = [32, 128], strides = [1, 1]} : vector<128x128xf32> to vector<32x128xf32>
    %228 = math.tanh %221 : vector<8x32xf32>
    %cst_75 = arith.constant dense<0.000000e+00> : vector<8x128xf32>
    %229 = tpu.matmul %228, %226, %cst_75 {dimension_numbers = #tpu.dot_dimension_numbers<[1], [0], [0], [1], [0, 0, 1, 1], [], []>} : vector<8x32xf32>, vector<32x128xf32>, vector<8x128xf32> -> vector<8x128xf32>
    %230 = arith.addf %12, %229 : vector<8x128xf32>
    %231 = math.tanh %219 : vector<8x32xf32>
    %cst_76 = arith.constant dense<0.000000e+00> : vector<8x128xf32>
    %232 = tpu.matmul %231, %227, %cst_76 {dimension_numbers = #tpu.dot_dimension_numbers<[1], [0], [0], [1], [0, 0, 1, 1], [], []>} : vector<8x32xf32>, vector<32x128xf32>, vector<8x128xf32> -> vector<8x128xf32>
    %233 = arith.addf %230, %232 : vector<8x128xf32>
    %c0_77 = arith.constant 0 : index
    %c0_78 = arith.constant 0 : index
    %234 = vector.load %arg5[%c0_77, %c0_78] : memref<32x128xf32, #tpu.memory_space<vmem>>, vector<32x128xf32>
    %c0_79 = arith.constant 0 : index
    %c0_80 = arith.constant 0 : index
    %235 = vector.load %arg6[%c0_79, %c0_80] : memref<32x128xf32, #tpu.memory_space<vmem>>, vector<32x128xf32>
    %c0_81 = arith.constant 0 : index
    %c0_82 = arith.constant 0 : index
    %236 = vector.load %arg7[%c0_81, %c0_82] : memref<1x128xf32, #tpu.memory_space<vmem>>, vector<1x128xf32>
    %c0_83 = arith.constant 0 : index
    %c0_84 = arith.constant 0 : index
    %c0_85 = arith.constant 0 : index
    %237 = vector.load %arg12[%c0_83, %c0_84, %c0_85] : memref<8x8x32xf32, #tpu.memory_space<vmem>>, vector<8x8x32xf32>
    %238 = vector.shape_cast %237 : vector<8x8x32xf32> to vector<64x32xf32>
    %cst_86 = arith.constant dense<0.000000e+00> : vector<64x128xf32>
    %239 = tpu.matmul %238, %234, %cst_86 {dimension_numbers = #tpu.dot_dimension_numbers<[1], [0], [0], [1], [0, 0, 1, 1], [], []>} : vector<64x32xf32>, vector<32x128xf32>, vector<64x128xf32> -> vector<64x128xf32>
    %240 = vector.broadcast %236 : vector<1x128xf32> to vector<64x128xf32>
    %241 = arith.addf %239, %240 : vector<64x128xf32>
    %242 = vector.shape_cast %241 : vector<64x128xf32> to vector<8x8x128xf32>
    %c0_87 = arith.constant 0 : index
    %c0_88 = arith.constant 0 : index
    %c0_89 = arith.constant 0 : index
    %243 = vector.load %arg11[%c0_87, %c0_88, %c0_89] : memref<8x8x128xf32, #tpu.memory_space<vmem>>, vector<8x8x128xf32>
    tpu.vector_store %arg11[%c0_87, %c0_88, %c0_89], %242 {strides = array<i32>} : memref<8x8x128xf32, #tpu.memory_space<vmem>>, vector<8x8x128xf32>,
    %cst_90 = arith.constant 0.000000e+00 : f32
    %244 = vector.broadcast %cst_90 : f32 to vector<8x32xf32>
    %cst_91 = arith.constant 0.000000e+00 : f32
    %245 = vector.broadcast %cst_91 : f32 to vector<8x32xf32>
    %c0_i32_92 = arith.constant 0 : i32
    %246 = arith.index_cast %c0_i32_92 : i32 to index
    %c0_93 = arith.constant 0 : index
    %c0_94 = arith.constant 0 : index
    %247 = vector.load %arg11[%246, %c0_93, %c0_94] : memref<8x8x128xf32, #tpu.memory_space<vmem>>, vector<1x8x128xf32>
    %248 = vector.shape_cast %247 : vector<1x8x128xf32> to vector<8x128xf32>
    %cst_95 = arith.constant dense<0.000000e+00> : vector<8x128xf32>
    %249 = tpu.matmul %244, %235, %cst_95 {dimension_numbers = #tpu.dot_dimension_numbers<[1], [0], [0], [1], [0, 0, 1, 1], [], []>} : vector<8x32xf32>, vector<32x128xf32>, vector<8x128xf32> -> vector<8x128xf32>
    %250 = arith.addf %248, %249 : vector<8x128xf32>
    %251 = arith.mulf %250, %8 : vector<8x128xf32>
    %252 = math.tanh %251 : vector<8x128xf32>
    %cst_96 = arith.constant 5.000000e-01 : f32
    %253 = vector.broadcast %cst_96 : f32 to vector<8x128xf32>
    %254 = arith.mulf %253, %252 : vector<8x128xf32>
    %cst_97 = arith.constant 5.000000e-01 : f32
    %255 = vector.broadcast %cst_97 : f32 to vector<8x128xf32>
    %256 = arith.addf %254, %255 : vector<8x128xf32>
    %257 = arith.select %5, %252, %256 : vector<8x128xi1>, vector<8x128xf32>
    %258 = vector.extract_strided_slice %257 {offsets = [0, 0], sizes = [8, 32], strides = [1, 1]} : vector<8x128xf32> to vector<8x32xf32>
    %259 = vector.extract_strided_slice %257 {offsets = [0, 32], sizes = [8, 32], strides = [1, 1]} : vector<8x128xf32> to vector<8x32xf32>
    %260 = vector.extract_strided_slice %257 {offsets = [0, 64], sizes = [8, 32], strides = [1, 1]} : vector<8x128xf32> to vector<8x32xf32>
    %261 = vector.extract_strided_slice %257 {offsets = [0, 96], sizes = [8, 32], strides = [1, 1]} : vector<8x128xf32> to vector<8x32xf32>
    %262 = arith.mulf %259, %245 : vector<8x32xf32>
    %263 = arith.mulf %258, %260 : vector<8x32xf32>
    %264 = arith.addf %262, %263 : vector<8x32xf32>
    %265 = math.tanh %264 : vector<8x32xf32>
    %266 = arith.mulf %261, %265 : vector<8x32xf32>
    %c1_i32_98 = arith.constant 1 : i32
    %267 = arith.index_cast %c1_i32_98 : i32 to index
    %c0_99 = arith.constant 0 : index
    %c0_100 = arith.constant 0 : index
    %268 = vector.load %arg11[%267, %c0_99, %c0_100] : memref<8x8x128xf32, #tpu.memory_space<vmem>>, vector<1x8x128xf32>
    %269 = vector.shape_cast %268 : vector<1x8x128xf32> to vector<8x128xf32>
    %cst_101 = arith.constant dense<0.000000e+00> : vector<8x128xf32>
    %270 = tpu.matmul %266, %235, %cst_101 {dimension_numbers = #tpu.dot_dimension_numbers<[1], [0], [0], [1], [0, 0, 1, 1], [], []>} : vector<8x32xf32>, vector<32x128xf32>, vector<8x128xf32> -> vector<8x128xf32>
    %271 = arith.addf %269, %270 : vector<8x128xf32>
    %272 = arith.mulf %271, %8 : vector<8x128xf32>
    %273 = math.tanh %272 : vector<8x128xf32>
    %cst_102 = arith.constant 5.000000e-01 : f32
    %274 = vector.broadcast %cst_102 : f32 to vector<8x128xf32>
    %275 = arith.mulf %274, %273 : vector<8x128xf32>
    %cst_103 = arith.constant 5.000000e-01 : f32
    %276 = vector.broadcast %cst_103 : f32 to vector<8x128xf32>
    %277 = arith.addf %275, %276 : vector<8x128xf32>
    %278 = arith.select %5, %273, %277 : vector<8x128xi1>, vector<8x128xf32>
    %279 = vector.extract_strided_slice %278 {offsets = [0, 0], sizes = [8, 32], strides = [1, 1]} : vector<8x128xf32> to vector<8x32xf32>
    %280 = vector.extract_strided_slice %278 {offsets = [0, 32], sizes = [8, 32], strides = [1, 1]} : vector<8x128xf32> to vector<8x32xf32>
    %281 = vector.extract_strided_slice %278 {offsets = [0, 64], sizes = [8, 32], strides = [1, 1]} : vector<8x128xf32> to vector<8x32xf32>
    %282 = vector.extract_strided_slice %278 {offsets = [0, 96], sizes = [8, 32], strides = [1, 1]} : vector<8x128xf32> to vector<8x32xf32>
    %283 = arith.mulf %280, %264 : vector<8x32xf32>
    %284 = arith.mulf %279, %281 : vector<8x32xf32>
    %285 = arith.addf %283, %284 : vector<8x32xf32>
    %286 = math.tanh %285 : vector<8x32xf32>
    %287 = arith.mulf %282, %286 : vector<8x32xf32>
    %c2_i32_104 = arith.constant 2 : i32
    %288 = arith.index_cast %c2_i32_104 : i32 to index
    %c0_105 = arith.constant 0 : index
    %c0_106 = arith.constant 0 : index
    %289 = vector.load %arg11[%288, %c0_105, %c0_106] : memref<8x8x128xf32, #tpu.memory_space<vmem>>, vector<1x8x128xf32>
    %290 = vector.shape_cast %289 : vector<1x8x128xf32> to vector<8x128xf32>
    %cst_107 = arith.constant dense<0.000000e+00> : vector<8x128xf32>
    %291 = tpu.matmul %287, %235, %cst_107 {dimension_numbers = #tpu.dot_dimension_numbers<[1], [0], [0], [1], [0, 0, 1, 1], [], []>} : vector<8x32xf32>, vector<32x128xf32>, vector<8x128xf32> -> vector<8x128xf32>
    %292 = arith.addf %290, %291 : vector<8x128xf32>
    %293 = arith.mulf %292, %8 : vector<8x128xf32>
    %294 = math.tanh %293 : vector<8x128xf32>
    %cst_108 = arith.constant 5.000000e-01 : f32
    %295 = vector.broadcast %cst_108 : f32 to vector<8x128xf32>
    %296 = arith.mulf %295, %294 : vector<8x128xf32>
    %cst_109 = arith.constant 5.000000e-01 : f32
    %297 = vector.broadcast %cst_109 : f32 to vector<8x128xf32>
    %298 = arith.addf %296, %297 : vector<8x128xf32>
    %299 = arith.select %5, %294, %298 : vector<8x128xi1>, vector<8x128xf32>
    %300 = vector.extract_strided_slice %299 {offsets = [0, 0], sizes = [8, 32], strides = [1, 1]} : vector<8x128xf32> to vector<8x32xf32>
    %301 = vector.extract_strided_slice %299 {offsets = [0, 32], sizes = [8, 32], strides = [1, 1]} : vector<8x128xf32> to vector<8x32xf32>
    %302 = vector.extract_strided_slice %299 {offsets = [0, 64], sizes = [8, 32], strides = [1, 1]} : vector<8x128xf32> to vector<8x32xf32>
    %303 = vector.extract_strided_slice %299 {offsets = [0, 96], sizes = [8, 32], strides = [1, 1]} : vector<8x128xf32> to vector<8x32xf32>
    %304 = arith.mulf %301, %285 : vector<8x32xf32>
    %305 = arith.mulf %300, %302 : vector<8x32xf32>
    %306 = arith.addf %304, %305 : vector<8x32xf32>
    %307 = math.tanh %306 : vector<8x32xf32>
    %308 = arith.mulf %303, %307 : vector<8x32xf32>
    %c3_i32_110 = arith.constant 3 : i32
    %309 = arith.index_cast %c3_i32_110 : i32 to index
    %c0_111 = arith.constant 0 : index
    %c0_112 = arith.constant 0 : index
    %310 = vector.load %arg11[%309, %c0_111, %c0_112] : memref<8x8x128xf32, #tpu.memory_space<vmem>>, vector<1x8x128xf32>
    %311 = vector.shape_cast %310 : vector<1x8x128xf32> to vector<8x128xf32>
    %cst_113 = arith.constant dense<0.000000e+00> : vector<8x128xf32>
    %312 = tpu.matmul %308, %235, %cst_113 {dimension_numbers = #tpu.dot_dimension_numbers<[1], [0], [0], [1], [0, 0, 1, 1], [], []>} : vector<8x32xf32>, vector<32x128xf32>, vector<8x128xf32> -> vector<8x128xf32>
    %313 = arith.addf %311, %312 : vector<8x128xf32>
    %314 = arith.mulf %313, %8 : vector<8x128xf32>
    %315 = math.tanh %314 : vector<8x128xf32>
    %cst_114 = arith.constant 5.000000e-01 : f32
    %316 = vector.broadcast %cst_114 : f32 to vector<8x128xf32>
    %317 = arith.mulf %316, %315 : vector<8x128xf32>
    %cst_115 = arith.constant 5.000000e-01 : f32
    %318 = vector.broadcast %cst_115 : f32 to vector<8x128xf32>
    %319 = arith.addf %317, %318 : vector<8x128xf32>
    %320 = arith.select %5, %315, %319 : vector<8x128xi1>, vector<8x128xf32>
    %321 = vector.extract_strided_slice %320 {offsets = [0, 0], sizes = [8, 32], strides = [1, 1]} : vector<8x128xf32> to vector<8x32xf32>
    %322 = vector.extract_strided_slice %320 {offsets = [0, 32], sizes = [8, 32], strides = [1, 1]} : vector<8x128xf32> to vector<8x32xf32>
    %323 = vector.extract_strided_slice %320 {offsets = [0, 64], sizes = [8, 32], strides = [1, 1]} : vector<8x128xf32> to vector<8x32xf32>
    %324 = vector.extract_strided_slice %320 {offsets = [0, 96], sizes = [8, 32], strides = [1, 1]} : vector<8x128xf32> to vector<8x32xf32>
    %325 = arith.mulf %322, %306 : vector<8x32xf32>
    %326 = arith.mulf %321, %323 : vector<8x32xf32>
    %327 = arith.addf %325, %326 : vector<8x32xf32>
    %328 = math.tanh %327 : vector<8x32xf32>
    %329 = arith.mulf %324, %328 : vector<8x32xf32>
    %c4_i32_116 = arith.constant 4 : i32
    %330 = arith.index_cast %c4_i32_116 : i32 to index
    %c0_117 = arith.constant 0 : index
    %c0_118 = arith.constant 0 : index
    %331 = vector.load %arg11[%330, %c0_117, %c0_118] : memref<8x8x128xf32, #tpu.memory_space<vmem>>, vector<1x8x128xf32>
    %332 = vector.shape_cast %331 : vector<1x8x128xf32> to vector<8x128xf32>
    %cst_119 = arith.constant dense<0.000000e+00> : vector<8x128xf32>
    %333 = tpu.matmul %329, %235, %cst_119 {dimension_numbers = #tpu.dot_dimension_numbers<[1], [0], [0], [1], [0, 0, 1, 1], [], []>} : vector<8x32xf32>, vector<32x128xf32>, vector<8x128xf32> -> vector<8x128xf32>
    %334 = arith.addf %332, %333 : vector<8x128xf32>
    %335 = arith.mulf %334, %8 : vector<8x128xf32>
    %336 = math.tanh %335 : vector<8x128xf32>
    %cst_120 = arith.constant 5.000000e-01 : f32
    %337 = vector.broadcast %cst_120 : f32 to vector<8x128xf32>
    %338 = arith.mulf %337, %336 : vector<8x128xf32>
    %cst_121 = arith.constant 5.000000e-01 : f32
    %339 = vector.broadcast %cst_121 : f32 to vector<8x128xf32>
    %340 = arith.addf %338, %339 : vector<8x128xf32>
    %341 = arith.select %5, %336, %340 : vector<8x128xi1>, vector<8x128xf32>
    %342 = vector.extract_strided_slice %341 {offsets = [0, 0], sizes = [8, 32], strides = [1, 1]} : vector<8x128xf32> to vector<8x32xf32>
    %343 = vector.extract_strided_slice %341 {offsets = [0, 32], sizes = [8, 32], strides = [1, 1]} : vector<8x128xf32> to vector<8x32xf32>
    %344 = vector.extract_strided_slice %341 {offsets = [0, 64], sizes = [8, 32], strides = [1, 1]} : vector<8x128xf32> to vector<8x32xf32>
    %345 = vector.extract_strided_slice %341 {offsets = [0, 96], sizes = [8, 32], strides = [1, 1]} : vector<8x128xf32> to vector<8x32xf32>
    %346 = arith.mulf %343, %327 : vector<8x32xf32>
    %347 = arith.mulf %342, %344 : vector<8x32xf32>
    %348 = arith.addf %346, %347 : vector<8x32xf32>
    %349 = math.tanh %348 : vector<8x32xf32>
    %350 = arith.mulf %345, %349 : vector<8x32xf32>
    %c5_i32_122 = arith.constant 5 : i32
    %351 = arith.index_cast %c5_i32_122 : i32 to index
    %c0_123 = arith.constant 0 : index
    %c0_124 = arith.constant 0 : index
    %352 = vector.load %arg11[%351, %c0_123, %c0_124] : memref<8x8x128xf32, #tpu.memory_space<vmem>>, vector<1x8x128xf32>
    %353 = vector.shape_cast %352 : vector<1x8x128xf32> to vector<8x128xf32>
    %cst_125 = arith.constant dense<0.000000e+00> : vector<8x128xf32>
    %354 = tpu.matmul %350, %235, %cst_125 {dimension_numbers = #tpu.dot_dimension_numbers<[1], [0], [0], [1], [0, 0, 1, 1], [], []>} : vector<8x32xf32>, vector<32x128xf32>, vector<8x128xf32> -> vector<8x128xf32>
    %355 = arith.addf %353, %354 : vector<8x128xf32>
    %356 = arith.mulf %355, %8 : vector<8x128xf32>
    %357 = math.tanh %356 : vector<8x128xf32>
    %cst_126 = arith.constant 5.000000e-01 : f32
    %358 = vector.broadcast %cst_126 : f32 to vector<8x128xf32>
    %359 = arith.mulf %358, %357 : vector<8x128xf32>
    %cst_127 = arith.constant 5.000000e-01 : f32
    %360 = vector.broadcast %cst_127 : f32 to vector<8x128xf32>
    %361 = arith.addf %359, %360 : vector<8x128xf32>
    %362 = arith.select %5, %357, %361 : vector<8x128xi1>, vector<8x128xf32>
    %363 = vector.extract_strided_slice %362 {offsets = [0, 0], sizes = [8, 32], strides = [1, 1]} : vector<8x128xf32> to vector<8x32xf32>
    %364 = vector.extract_strided_slice %362 {offsets = [0, 32], sizes = [8, 32], strides = [1, 1]} : vector<8x128xf32> to vector<8x32xf32>
    %365 = vector.extract_strided_slice %362 {offsets = [0, 64], sizes = [8, 32], strides = [1, 1]} : vector<8x128xf32> to vector<8x32xf32>
    %366 = vector.extract_strided_slice %362 {offsets = [0, 96], sizes = [8, 32], strides = [1, 1]} : vector<8x128xf32> to vector<8x32xf32>
    %367 = arith.mulf %364, %348 : vector<8x32xf32>
    %368 = arith.mulf %363, %365 : vector<8x32xf32>
    %369 = arith.addf %367, %368 : vector<8x32xf32>
    %370 = math.tanh %369 : vector<8x32xf32>
    %371 = arith.mulf %366, %370 : vector<8x32xf32>
    %c6_i32_128 = arith.constant 6 : i32
    %372 = arith.index_cast %c6_i32_128 : i32 to index
    %c0_129 = arith.constant 0 : index
    %c0_130 = arith.constant 0 : index
    %373 = vector.load %arg11[%372, %c0_129, %c0_130] : memref<8x8x128xf32, #tpu.memory_space<vmem>>, vector<1x8x128xf32>
    %374 = vector.shape_cast %373 : vector<1x8x128xf32> to vector<8x128xf32>
    %cst_131 = arith.constant dense<0.000000e+00> : vector<8x128xf32>
    %375 = tpu.matmul %371, %235, %cst_131 {dimension_numbers = #tpu.dot_dimension_numbers<[1], [0], [0], [1], [0, 0, 1, 1], [], []>} : vector<8x32xf32>, vector<32x128xf32>, vector<8x128xf32> -> vector<8x128xf32>
    %376 = arith.addf %374, %375 : vector<8x128xf32>
    %377 = arith.mulf %376, %8 : vector<8x128xf32>
    %378 = math.tanh %377 : vector<8x128xf32>
    %cst_132 = arith.constant 5.000000e-01 : f32
    %379 = vector.broadcast %cst_132 : f32 to vector<8x128xf32>
    %380 = arith.mulf %379, %378 : vector<8x128xf32>
    %cst_133 = arith.constant 5.000000e-01 : f32
    %381 = vector.broadcast %cst_133 : f32 to vector<8x128xf32>
    %382 = arith.addf %380, %381 : vector<8x128xf32>
    %383 = arith.select %5, %378, %382 : vector<8x128xi1>, vector<8x128xf32>
    %384 = vector.extract_strided_slice %383 {offsets = [0, 0], sizes = [8, 32], strides = [1, 1]} : vector<8x128xf32> to vector<8x32xf32>
    %385 = vector.extract_strided_slice %383 {offsets = [0, 32], sizes = [8, 32], strides = [1, 1]} : vector<8x128xf32> to vector<8x32xf32>
    %386 = vector.extract_strided_slice %383 {offsets = [0, 64], sizes = [8, 32], strides = [1, 1]} : vector<8x128xf32> to vector<8x32xf32>
    %387 = vector.extract_strided_slice %383 {offsets = [0, 96], sizes = [8, 32], strides = [1, 1]} : vector<8x128xf32> to vector<8x32xf32>
    %388 = arith.mulf %385, %369 : vector<8x32xf32>
    %389 = arith.mulf %384, %386 : vector<8x32xf32>
    %390 = arith.addf %388, %389 : vector<8x32xf32>
    %391 = math.tanh %390 : vector<8x32xf32>
    %392 = arith.mulf %387, %391 : vector<8x32xf32>
    %c7_i32_134 = arith.constant 7 : i32
    %393 = arith.index_cast %c7_i32_134 : i32 to index
    %c0_135 = arith.constant 0 : index
    %c0_136 = arith.constant 0 : index
    %394 = vector.load %arg11[%393, %c0_135, %c0_136] : memref<8x8x128xf32, #tpu.memory_space<vmem>>, vector<1x8x128xf32>
    %395 = vector.shape_cast %394 : vector<1x8x128xf32> to vector<8x128xf32>
    %cst_137 = arith.constant dense<0.000000e+00> : vector<8x128xf32>
    %396 = tpu.matmul %392, %235, %cst_137 {dimension_numbers = #tpu.dot_dimension_numbers<[1], [0], [0], [1], [0, 0, 1, 1], [], []>} : vector<8x32xf32>, vector<32x128xf32>, vector<8x128xf32> -> vector<8x128xf32>
    %397 = arith.addf %395, %396 : vector<8x128xf32>
    %398 = arith.mulf %397, %8 : vector<8x128xf32>
    %399 = math.tanh %398 : vector<8x128xf32>
    %cst_138 = arith.constant 5.000000e-01 : f32
    %400 = vector.broadcast %cst_138 : f32 to vector<8x128xf32>
    %401 = arith.mulf %400, %399 : vector<8x128xf32>
    %cst_139 = arith.constant 5.000000e-01 : f32
    %402 = vector.broadcast %cst_139 : f32 to vector<8x128xf32>
    %403 = arith.addf %401, %402 : vector<8x128xf32>
    %404 = arith.select %5, %399, %403 : vector<8x128xi1>, vector<8x128xf32>
    %405 = vector.extract_strided_slice %404 {offsets = [0, 0], sizes = [8, 32], strides = [1, 1]} : vector<8x128xf32> to vector<8x32xf32>
    %406 = vector.extract_strided_slice %404 {offsets = [0, 32], sizes = [8, 32], strides = [1, 1]} : vector<8x128xf32> to vector<8x32xf32>
    %407 = vector.extract_strided_slice %404 {offsets = [0, 64], sizes = [8, 32], strides = [1, 1]} : vector<8x128xf32> to vector<8x32xf32>
    %408 = vector.extract_strided_slice %404 {offsets = [0, 96], sizes = [8, 32], strides = [1, 1]} : vector<8x128xf32> to vector<8x32xf32>
    %409 = arith.mulf %406, %390 : vector<8x32xf32>
    %410 = arith.mulf %405, %407 : vector<8x32xf32>
    %411 = arith.addf %409, %410 : vector<8x32xf32>
    %412 = math.tanh %411 : vector<8x32xf32>
    %413 = arith.mulf %408, %412 : vector<8x32xf32>
    %c8_i32_140 = arith.constant 8 : i32
    %414 = vector.extract_strided_slice %9 {offsets = [64, 0], sizes = [32, 128], strides = [1, 1]} : vector<128x128xf32> to vector<32x128xf32>
    %415 = vector.extract_strided_slice %9 {offsets = [96, 0], sizes = [32, 128], strides = [1, 1]} : vector<128x128xf32> to vector<32x128xf32>
    %416 = math.tanh %413 : vector<8x32xf32>
    %cst_141 = arith.constant dense<0.000000e+00> : vector<8x128xf32>
    %417 = tpu.matmul %416, %414, %cst_141 {dimension_numbers = #tpu.dot_dimension_numbers<[1], [0], [0], [1], [0, 0, 1, 1], [], []>} : vector<8x32xf32>, vector<32x128xf32>, vector<8x128xf32> -> vector<8x128xf32>
    %418 = arith.addf %233, %417 : vector<8x128xf32>
    %419 = math.tanh %411 : vector<8x32xf32>
    %cst_142 = arith.constant dense<0.000000e+00> : vector<8x128xf32>
    %420 = tpu.matmul %419, %415, %cst_142 {dimension_numbers = #tpu.dot_dimension_numbers<[1], [0], [0], [1], [0, 0, 1, 1], [], []>} : vector<8x32xf32>, vector<32x128xf32>, vector<8x128xf32> -> vector<8x128xf32>
    %421 = arith.addf %418, %420 : vector<8x128xf32>
    %c0_143 = arith.constant 0 : index
    %c0_144 = arith.constant 0 : index
    %422 = vector.load %arg10[%c0_143, %c0_144] : memref<8x128xf32, #tpu.memory_space<vmem>>, vector<8x128xf32>
    tpu.vector_store %arg10[%c0_143, %c0_144], %421 {strides = array<i32>} : memref<8x128xf32, #tpu.memory_space<vmem>>, vector<8x128xf32>,
    return
  }
  func.func @transform_0(%arg0: i32) -> (i32, i32, i32) {
    %c0_i32 = arith.constant 0 : i32
    %c0_i32_0 = arith.constant 0 : i32
    %c0_i32_1 = arith.constant 0 : i32
    return %c0_i32, %arg0, %c0_i32_0 : i32, i32, i32
  }
  func.func @transform_1(%arg0: i32) -> (i32, i32) {
    %c0_i32 = arith.constant 0 : i32
    %c0_i32_0 = arith.constant 0 : i32
    %c0_i32_1 = arith.constant 0 : i32
    return %c0_i32, %c0_i32_0 : i32, i32
  }
  func.func @transform_2(%arg0: i32) -> (i32, i32) {
    %c0_i32 = arith.constant 0 : i32
    %c0_i32_0 = arith.constant 0 : i32
    %c0_i32_1 = arith.constant 0 : i32
    return %c0_i32, %c0_i32_0 : i32, i32
  }
  func.func @transform_3(%arg0: i32) -> (i32, i32) {
    %c0_i32 = arith.constant 0 : i32
    %c0_i32_0 = arith.constant 0 : i32
    %c0_i32_1 = arith.constant 0 : i32
    return %c0_i32, %c0_i32_0 : i32, i32
  }
  func.func @transform_4(%arg0: i32) -> (i32, i32) {
    %c0_i32 = arith.constant 0 : i32
    %c0_i32_0 = arith.constant 0 : i32
    %c0_i32_1 = arith.constant 0 : i32
    return %c0_i32, %c0_i32_0 : i32, i32
  }
  func.func @transform_5(%arg0: i32) -> (i32, i32) {
    %c0_i32 = arith.constant 0 : i32
    %c0_i32_0 = arith.constant 0 : i32
    %c0_i32_1 = arith.constant 0 : i32
    return %c0_i32, %c0_i32_0 : i32, i32
  }
  func.func @transform_6(%arg0: i32) -> (i32, i32) {
    %c0_i32 = arith.constant 0 : i32
    %c0_i32_0 = arith.constant 0 : i32
    %c0_i32_1 = arith.constant 0 : i32
    return %c0_i32, %c0_i32_0 : i32, i32
  }
  func.func @transform_7(%arg0: i32) -> (i32, i32) {
    %c0_i32 = arith.constant 0 : i32
    %c0_i32_0 = arith.constant 0 : i32
    %c0_i32_1 = arith.constant 0 : i32
    return %c0_i32, %c0_i32_0 : i32, i32
  }
  func.func @transform_8(%arg0: i32) -> (i32, i32) {
    %c0_i32 = arith.constant 0 : i32
    %c0_i32_0 = arith.constant 0 : i32
    %c0_i32_1 = arith.constant 0 : i32
    return %c0_i32, %c0_i32_0 : i32, i32
  }
  func.func @transform_9(%arg0: i32) -> (i32, i32) {
    %c0_i32 = arith.constant 0 : i32
    %c0_i32_0 = arith.constant 0 : i32
    return %arg0, %c0_i32 : i32, i32
  }
}

</mosaic_0001>

<bundles_post_ra>
// kernel: tpu_custom_call.1
= control target key start
LH: loop header
LB: loop body
LE: loop exit
PB: predicated region body
PF: predicated region fallthrough
CT: control target
= control target key end

     0   :  { %14 = vsyncpa [#allocation5], 0  ;;  %s3779_s0 = inlined_call_operand.hbm [shape: f32[8,8,32], index: 0, kind: input, shape index: {}]   ;;  %s3780_s1 = inlined_call_operand.hbm [shape: f32[32,128], index: 1, kind: input, shape index: {}]   ;;  %s3781_s2 = inlined_call_operand.hbm [shape: f32[32,128], index: 2, kind: input, shape index: {}]   ;;  %s3782_s3 = inlined_call_operand.vmem [shape: f32[1,128], index: 3, kind: input, shape index: {}]   ;;  %s3783_s4 = inlined_call_operand.hbm [shape: f32[32,128], index: 4, kind: input, shape index: {}]   ;;  %s3784_s5 = inlined_call_operand.hbm [shape: f32[32,128], index: 5, kind: input, shape index: {}]   ;;  %s3785_s6 = inlined_call_operand.vmem [shape: f32[1,128], index: 6, kind: input, shape index: {}]   ;;  %s3786_s7 = inlined_call_operand.hbm [shape: f32[128,128], index: 7, kind: input, shape index: {}]   ;;  %s3787_s8 = inlined_call_operand.vmem [shape: f32[1,128], index: 8, kind: input, shape index: {}]   ;;  %s3788_s9 = inlined_call_operand.hbm [shape: f32[8,128], index: 9, kind: output, shape index: {}]  }
   0x1   :  { %15 = vsyncpa [#allocation8], 0 }
   0x2   :  { %16 = vsyncpa [#allocation11], 0 }
   0x3   :  { %17 = vsyncpa [#allocation14], 0 }
   0x4   :  { %18 = vsyncpa [#allocation6], 0  ;;  %s3238_s30 = smov [#allocation7]   ;;  %s3239_s11 = smov [#allocation10]  }
   0x5   :  { %s36_s10 = sshll.u32 %s3238_s30, 4  ;;  %s62_s12 = sshll.u32 %s3239_s11, 4  ;;  %s37_s10 = int_to_ptr.vmem [resolvable:$true] %s36_s10  ;;  %s3304_s12 = int_to_ptr.vmem [resolvable:$true] %s62_s12 }
   0x6   :  { %s3074_s15 = scalar_lea.hbm %s3780_s1, 512 }
   0x7   :  { %p3075_p0 = scmp.ne.s32.totalorder %s3780_s1, %s3074_s15  ;;  %p3078_p1 = scmp.lt.u32.totalorder %s3074_s15, %s3780_s1 }
   0x9   :  { %p3080_p2 = pnand %p3078_p1, %p3075_p0 }
   0xb   :  { %3083 = shalt.err (!%p3080_p2)
}
   0xc   :  { %s3084_s20 = scalar_lea.vmem %s37_s10, 512  ;;  %p3089_p4 = scmp.lt.s32.totalorder %s37_s10, %s37_s10 }
   0xd   :  { %p3085_p3 = scmp.ne.s32.totalorder %s37_s10, %s3084_s20  ;;  %p3090_p5 = scmp.lt.s32.totalorder %s3084_s20, %s3084_s20 }
   0xf   :  { %p3091_p6 = por %p3090_p5, %p3089_p4 }
  0x11   :  { %p3092_p7 = pnand %p3091_p6, %p3085_p3 }
  0x13   :  { %3095 = shalt.err (!%p3092_p7)
}
  0x14   :  { %s3240_s21 = smov 128   ;;  %s3241_s22 = smov 8  }
  0x15   :  { %42 = dma.hbm_to_vmem [thread:$0]  %s3780_s1, 512, %s37_s10, [#allocation8], %s3240_s21, %s3240_s21, %s3241_s22  }
  0x16   :  { %s3096_s27 = scalar_lea.hbm %s3783_s4, 512 }
  0x17   :  { %p3097_p8 = scmp.ne.s32.totalorder %s3783_s4, %s3096_s27  ;;  %p3100_p9 = scmp.lt.u32.totalorder %s3096_s27, %s3783_s4 }
  0x19   :  { %p3102_p10 = pnand %p3100_p9, %p3097_p8 }
  0x1b   :  { %3105 = shalt.err (!%p3102_p10)
}
  0x1c   :  { %s3106_s13 = scalar_lea.vmem %s3304_s12, 512  ;;  %p3111_p12 = scmp.lt.s32.totalorder %s3304_s12, %s3304_s12 }
  0x1d   :  { %p3107_p11 = scmp.ne.s32.totalorder %s3304_s12, %s3106_s13  ;;  %p3112_p13 = scmp.lt.s32.totalorder %s3106_s13, %s3106_s13 }
  0x1f   :  { %p3113_p0 = por %p3112_p13, %p3111_p12 }
  0x21   :  { %p3114_p1 = pnand %p3113_p0, %p3107_p11 }
  0x23   :  { %3117 = shalt.err (!%p3114_p1)
}
  0x24   :  { %68 = dma.hbm_to_vmem [thread:$0]  %s3783_s4, 512, %s3304_s12, [#allocation11], %s3240_s21, %s3240_s21, %s3241_s22  }
  0x25   :  { %s3242_s14 = smov [#allocation4]   ;;  %s3243_s16 = smov [#allocation9]  }
  0x26   :  { %s24_s15 = sshll.u32 %s3242_s14, 4  ;;  %s48_s17 = sshll.u32 %s3243_s16, 4  ;;  %s25_s15 = int_to_ptr.vmem [resolvable:$true] %s24_s15  ;;  %s3341_s17 = int_to_ptr.vmem [resolvable:$true] %s48_s17 }
  0x27   :  { %s3118_s20 = scalar_lea.hbm %s3779_s0, 1024 }
  0x28   :  { %p3119_p2 = scmp.ne.s32.totalorder %s3779_s0, %s3118_s20  ;;  %p3122_p3 = scmp.lt.u32.totalorder %s3118_s20, %s3779_s0 }
  0x2a   :  { %p3124_p4 = pnand %p3122_p3, %p3119_p2 }
  0x2c   :  { %3127 = shalt.err (!%p3124_p4)
}
  0x2d   :  { %s3128_s4 = scalar_lea.vmem %s25_s15, 1024  ;;  %p3133_p6 = scmp.lt.s32.totalorder %s25_s15, %s25_s15 }
  0x2e   :  { %p3129_p5 = scmp.ne.s32.totalorder %s25_s15, %s3128_s4  ;;  %p3134_p7 = scmp.lt.s32.totalorder %s3128_s4, %s3128_s4 }
  0x30   :  { %p3135_p8 = por %p3134_p7, %p3133_p6 }
  0x32   :  { %p3136_p9 = pnand %p3135_p8, %p3129_p5 }
  0x34   :  { %3139 = shalt.err (!%p3136_p9)
}
  0x35   :  { %30 = dma.hbm_to_vmem [thread:$0]  %s3779_s0, 1024, %s25_s15, [#allocation5], %s3240_s21, %s3240_s21, %s3241_s22  }
  0x36   :  { %s3140_s30 = scalar_lea.hbm %s3781_s2, 512 }
  0x37   :  { %p3141_p10 = scmp.ne.s32.totalorder %s3781_s2, %s3140_s30  ;;  %p3144_p11 = scmp.lt.u32.totalorder %s3140_s30, %s3781_s2 }
  0x39   :  { %p3146_p12 = pnand %p3144_p11, %p3141_p10 }
  0x3b   :  { %3149 = shalt.err (!%p3146_p12)
}
  0x3c   :  { %s3150_s14 = scalar_lea.vmem %s3341_s17, 512  ;;  %p3155_p0 = scmp.lt.s32.totalorder %s3341_s17, %s3341_s17 }
  0x3d   :  { %p3151_p13 = scmp.ne.s32.totalorder %s3341_s17, %s3150_s14  ;;  %p3156_p1 = scmp.lt.s32.totalorder %s3150_s14, %s3150_s14 }
  0x3f   :  { %p3157_p2 = por %p3156_p1, %p3155_p0 }
  0x41   :  { %p3158_p3 = pnand %p3157_p2, %p3151_p13 }
  0x43   :  { %3161 = shalt.err (!%p3158_p3)
}
  0x44   :  { %54 = dma.hbm_to_vmem [thread:$0]  %s3781_s2, 512, %s3341_s17, [#allocation8], %s3240_s21, %s3240_s21, %s3241_s22  }
  0x45   :  { %s3244_s16 = smov [#allocation12]   ;;  %s3245_s19 = smov [#allocation13]  }
  0x46   :  { %s74_s18 = sshll.u32 %s3244_s16, 4  ;;  %s88_s20 = sshll.u32 %s3245_s19, 4  ;;  %s75_s18 = int_to_ptr.vmem [resolvable:$true] %s74_s18  ;;  %s3378_s20 = int_to_ptr.vmem [resolvable:$true] %s88_s20 }
  0x47   :  { %s3162_s25 = scalar_lea.hbm %s3784_s5, 512 }
  0x48   :  { %p3163_p4 = scmp.ne.s32.totalorder %s3784_s5, %s3162_s25  ;;  %p3166_p5 = scmp.lt.u32.totalorder %s3162_s25, %s3784_s5 }
  0x4a   :  { %p3168_p6 = pnand %p3166_p5, %p3163_p4 }
  0x4c   :  { %3171 = shalt.err (!%p3168_p6)
}
  0x4d   :  { %s3172_s2 = scalar_lea.vmem %s75_s18, 512  ;;  %p3177_p8 = scmp.lt.s32.totalorder %s75_s18, %s75_s18 }
  0x4e   :  { %p3173_p7 = scmp.ne.s32.totalorder %s75_s18, %s3172_s2  ;;  %p3178_p9 = scmp.lt.s32.totalorder %s3172_s2, %s3172_s2 }
  0x50   :  { %p3179_p10 = por %p3178_p9, %p3177_p8 }
  0x52   :  { %p3180_p11 = pnand %p3179_p10, %p3173_p7 }
  0x54   :  { %3183 = shalt.err (!%p3180_p11)
}
  0x55   :  { %80 = dma.hbm_to_vmem [thread:$0]  %s3784_s5, 512, %s75_s18, [#allocation11], %s3240_s21, %s3240_s21, %s3241_s22  }
  0x56   :  { %s3184_s11 = scalar_lea.hbm %s3786_s7, 2048 }
  0x57   :  { %p3185_p12 = scmp.ne.s32.totalorder %s3786_s7, %s3184_s11  ;;  %p3188_p13 = scmp.lt.u32.totalorder %s3184_s11, %s3786_s7 }
  0x59   :  { %p3190_p0 = pnand %p3188_p13, %p3185_p12 }
  0x5b   :  { %3193 = shalt.err (!%p3190_p0)
}
  0x5c   :  { %s3194_s0 = scalar_lea.vmem %s3378_s20, 2048  ;;  %p3199_p2 = scmp.lt.s32.totalorder %s3378_s20, %s3378_s20 }
  0x5d   :  { %p3195_p1 = scmp.ne.s32.totalorder %s3378_s20, %s3194_s0  ;;  %p3200_p3 = scmp.lt.s32.totalorder %s3194_s0, %s3194_s0 }
  0x5f   :  { %p3201_p4 = por %p3200_p3, %p3199_p2 }
  0x61   :  { %p3202_p5 = pnand %p3201_p4, %p3195_p1 }
  0x63   :  { %3205 = shalt.err (!%p3202_p5)
}
  0x64   :  { %94 = dma.hbm_to_vmem [thread:$0]  %s3786_s7, 2048, %s3378_s20, [#allocation14], %s3240_s21, %s3240_s21, %s3241_s22  }
  0x65   :  { %3228 = dma.done.wait [#allocation5], 1024  }
  0x66   :  { %3229 = vsyncadd [#allocation5], 4294966272 }
  0x67   :  { %3230 = dma.done.wait [#allocation8], 1024  }
  0x68   :  { %3231 = vsyncadd [#allocation8], 4294966272 }
  0x69   :  { %3232 = dma.done.wait [#allocation11], 1024  }
  0x6a   :  { %3233 = vsyncadd [#allocation11], 4294966272 }
  0x6b   :  { %3234 = dma.done.wait [#allocation14], 2048  }
  0x6c   :  { %3235 = vsyncadd [#allocation14], 4294965248  ;;  %v144_v0 = vld [vmem:[#allocation7] sm:$0xff]  ;;  %v145_v1 = vld [vmem:[#allocation7 + $0x8] sm:$0xff]  ;;  %v3246_v14 = vmov 0.0|0.0   ;;  %vm175_vm0 = vcmask 261120   ;;  %v115_v26 = vlaneseq }
  0x6d   :  { %v146_v2 = vld [vmem:[#allocation7 + $0x10] sm:$0xff]  ;;  %v2827_v3 = vpack.c.bf16 %v145_v1, %v144_v0  ;;  %v147_v4 = vld [vmem:[#allocation7 + $0x18] sm:$0xff]  ;;  %v157_v5 = vld [vmem:[#allocation4 + $0x20] sm:$0xff]  ;;  %vm3247_vm1 = vmmov 0   ;;  %v3248_v25 = vmov 0.0   ;;  %v3249_v37 = vmov 0.5  }
  0x6e   :  { %v158_v6 = vld [vmem:[#allocation4 + $0x28] sm:$0xff]  ;;  %v2831_v7 = vpack.c.bf16 %v147_v4, %v146_v2  ;;  %2990 = vtanh.f32 %v157_v5  ;;  %v153_v8 = vld [vmem:[#allocation4] sm:$0xff]  ;;  %v159_v9 = vld [vmem:[#allocation4 + $0x30] sm:$0xff]  ;;  %v116_v27 = vand.u32 127, %v115_v26  ;;  %s3251_s22 = smov 32   ;;  %s3252_s16 = smov 96  }
  0x6f   :  { %2963 = vmatprep.subr.bf16.mxu1 %v2827_v3  ;;  %2828 = vmatprep.subr.bf16.mxu0 %v2827_v3  ;;  %2992 = vtanh.f32 %v158_v6  ;;  %v154_v10 = vld [vmem:[#allocation4 + $0x8] sm:$0xff]  ;;  %v160_v11 = vld [vmem:[#allocation4 + $0x38] sm:$0xff]  ;;  %v148_v12 = vld [vmem:[#allocation9] sm:$0xff]  ;;  %s3253_s23 = smov [#allocation15]  }
  0x70   :  { %2965 = vmatpush3.bf16.msra.mxu1 %v2827_v3  ;;  %2830 = vmatpush3.bf16.msra.mxu0 %v2827_v3  ;;  %2994 = vtanh.f32 %v153_v8  ;;  %v149_v13 = vld [vmem:[#allocation9 + $0x8] sm:$0xff]  ;;  %v150_v17 = vld [vmem:[#allocation9 + $0x10] sm:$0xff]  ;;  %v151_v18 = vld [vmem:[#allocation9 + $0x18] sm:$0xff]  ;;  %vm117_vm2 = vcmp.ge.s32.totalorder %v116_v27, 64  ;;  %vm118_vm3 = vcmp.lt.s32.totalorder %v116_v27, 96  ;;  %s2394_s24 = sshll.u32 %s3253_s23, 4  ;;  %s2395_s24 = int_to_ptr.vmem [resolvable:$true] %s2394_s24 }
  0x71   :  { %2964 = vmatprep.subr.bf16.mxu1 %v2831_v7  ;;  %2832 = vmatprep.subr.bf16.mxu0 %v2831_v7  ;;  %2996 = vtanh.f32 %v159_v9  ;;  %v3417_v15 = vpack.c.bf16 %v149_v13, %v148_v12  ;;  %v3423_v22 = vpack.c.bf16 %v151_v18, %v150_v17  ;;  %v3451_v31 = vld [vmem:[%s3782_s3] ss:$0 sm:$0xff]  ;;  %vm3458_vm4 = vmand %vm117_vm2, %vm118_vm3  ;;  %s3250_s3 = smov 64   ;;  %v155_v6 = vld [vmem:[#allocation4 + $0x10] sm:$0xff]  ;;  %s3206_s25 = scalar_lea.vmem %s2395_s24, 128 }
  0x72   :  { %2998 = vtanh.f32 %v154_v10  ;;  %v3464_v38 = vsel %vm3458_vm4, 1.0, %v3249_v37  ;;  %p3207_p6 = scmp.ne.s32.totalorder %s2395_s24, %s3206_s25  ;;  %p3211_p7 = scmp.lt.s32.totalorder %s2395_s24, %s2395_s24 }
  0x73   :  { %3000 = vtanh.f32 %v160_v11  ;;  %p3212_p8 = scmp.lt.s32.totalorder %s3206_s25, %s3206_s25 }
  0x74   :  { %2966 = vmatpush3.bf16.msra.mxu1 %v2831_v7  ;;  %2834 = vmatpush3.bf16.msra.mxu0 %v2831_v7  ;;  %v156_v7 = vld [vmem:[#allocation4 + $0x18] sm:$0xff] }
  0x75   :  { %2835 = vmatprep.subr.bf16.mxu1 %v3246_v14  ;;  %2847 = vmatprep.subr.bf16.mxu0 %v3246_v14  ;;  %p3213_p9 = por %p3212_p8, %p3211_p7 }
  0x77   :  { %p3214_p10 = pnand %p3213_p9, %p3207_p6 }
  0x78   :  { %v2991_v16 = vpop.eup %2990 }
  0x79   :  { %v2993_v19 = vpop.eup %2992  ;;  %2581 = vmatprep.mubr.msk.f32.mxu1 %vm175_vm0, %v2991_v16 }
  0x7a   :  { %v2995_v20 = vpop.eup %2994  ;;  %2582 = vmatmul.mubr.msk.f32.vlgmr.msra.gmra.mrb[0].mxu1 %vm175_vm0, %v2993_v19 }
  0x7b   :  { %v2997_v21 = vpop.eup %2996  ;;  %2837 = vmatpush3.bf16.msra.mxu1 %v3417_v15  ;;  %2575 = vmatprep.mubr.msk.f32.mxu0 %vm175_vm0, %v2995_v20 }
  0x7c   :  { %v2999_v23 = vpop.eup %2998  ;;  %2584 = vmatprep.mubr.msk.f32.mxu1 %vm175_vm0, %v2997_v21  ;;  %2838 = vmatprep.subr.bf16.mxu1 %v3246_v14 }
  0x7d   :  { %v3001_v24 = vpop.eup %3000  ;;  %2576 = vmatmul.mubr.msk.f32.vlgmr.msra.gmra.mrb[0].mxu0 %vm175_vm0, %v2999_v23 }
  0x7e   :  { %2585 = vmatmul.mubr.msk.f32.gmra.mrb[2].mxu1 %vm175_vm0, %v3001_v24  ;;  %2849 = vmatpush3.bf16.msra.mxu0 %v3417_v15 }
  0x7f   :  { %2840 = vmatpush3.bf16.msra.mxu1 %v3423_v22  ;;  %2595 = vmatprep.mubr.msk.f32.mxu1 %vm3247_vm1, %v3248_v25 }
  0x80   :  { %2841 = vmatprep.subr.bf16.mxu1 %v3246_v14  ;;  %2850 = vmatprep.subr.bf16.mxu0 %v3246_v14 }
  0x82   :  { %2596 = vmatmul.mubr.f32.vlgmr.msra.gmra.mrb[4].mxu1 %v3248_v25  ;;  %2852 = vmatpush3.bf16.msra.mxu0 %v3423_v22 }
  0x83   :  { %2843 = vmatpush3.bf16.msra.mxu1 %v3417_v15  ;;  %2606 = vmatprep.mubr.msk.f32.mxu1 %vm3247_vm1, %v3248_v25 }
  0x84   :  { %2844 = vmatprep.subr.bf16.mxu1 %v3246_v14  ;;  %2859 = vmatprep.subr.bf16.mxu0 %v3246_v14 }
  0x87   :  { %2846 = vmatpush3.bf16.msra.mxu1 %v3423_v22 }
  0x88   :  { %2853 = vmatprep.subr.bf16.mxu1 %v3246_v14 }
 0x14d   :  { %v3444_v28 = vpop.f32.mrb[0].mxu1 }
 0x14e   :  { %v3446_v29 = vpop.f32.mrb[1].mxu1 }
 0x150   :  { %v2577_v30 = vpop.f32.mrb[0].mxu0 }
 0x151   :  { %v3453_v32 = vpop.f32.mrb[2].mxu1  ;;  %v266_v33 = vpop.f32.mrb[1].mxu0  ;;  %v272_v56 = vadd.f32 %v2577_v30, %v3451_v31 }
 0x152   :  { %v267_v34 = vadd.f32 %v3451_v31, %v266_v33  ;;  %v3456_v35 = vpop.f32.mrb[3].mxu1 }
 0x155   :  { %v383_v39 = vpop.f32.mrb[4].mxu1 }
 0x156   :  { %v387_v40 = vadd.f32 %v383_v39, %v267_v34  ;;  %v2597_v41 = vpop.f32.mrb[5].mxu1 }
 0x158   :  { %v388_v42 = vmul.f32 %v387_v40, %v3464_v38 }
 0x15a   :  { %3002 = vtanh.f32 %v388_v42 }
 0x164   :  { %v3003_v43 = vpop.eup %3002 }
 0x165   :  { %v390_v44 = vmul.f32 0.5, %v3003_v43 }
 0x167   :  { %v391_v45 = vadd.f32 0.5, %v390_v44 }
 0x169   :  { %v392_v46 = vsel %vm3458_vm4, %v3003_v43, %v391_v45 }
 0x16a   :  { %395 = vrot.lane.b32.xlu0 %v392_v46, %s3250_s3  ;;  %v393_v49 = vmul.f32 0.0, %v392_v46 }
 0x1dc   :  { %v396_v47 = vpop.permute.xlu0 %395 }
 0x1dd   :  { %v398_v48 = vmul.f32 %v396_v47, %v392_v46 }
 0x1df   :  { %400 = vrot.lane.b32.xlu0 %v398_v48, %s3251_s22 }
 0x251   :  { %v401_v50 = vpop.permute.xlu0 %400 }
 0x252   :  { %v403_v51 = vadd.f32 %v401_v50, %v393_v49 }
 0x254   :  { %3004 = vtanh.f32 %v403_v51 }
 0x25e   :  { %v3005_v52 = vpop.eup %3004 }
 0x25f   :  { %406 = vrot.lane.b32.xlu1 %v3005_v52, %s3250_s3 }
 0x2d1   :  { %v407_v53 = vpop.permute.xlu1 %406 }
 0x2d2   :  { %v409_v54 = vmul.f32 %v407_v53, %v392_v46 }
 0x2d4   :  { %411 = vrot.lane.b32.xlu1 %v409_v54, %s3251_s22 }
 0x346   :  { %v412_v55 = vpop.permute.xlu1 %411 }
 0x347   :  { %414 = vst.msk [vmem:[#allocation3] sm:$0xff] %vm175_vm0, %v412_v55  ;;  %2607 = vmatmul.mubr.msk.f32.vlgmr.msra.gmra.mrb[6].mxu1 %vm175_vm0, %v412_v55 }
 0x348   :  { %2855 = vmatpush3.bf16.msra.mxu1 %v3417_v15  ;;  %2628 = vmatprep.mubr.msk.f32.mxu1 %vm3247_vm1, %v3248_v25 }
 0x349   :  { %2856 = vmatprep.subr.bf16.mxu1 %v3246_v14 }
 0x34c   :  { %2858 = vmatpush3.bf16.msra.mxu1 %v3423_v22 }
 0x34d   :  { %2865 = vmatprep.subr.bf16.mxu1 %v3246_v14 }
 0x41a   :  { %v485_v57 = vpop.f32.mrb[6].mxu1 }
 0x41b   :  { %v489_v58 = vadd.f32 %v485_v57, %v272_v56  ;;  %v2608_v59 = vpop.f32.mrb[7].mxu1 }
 0x41d   :  { %v490_v60 = vmul.f32 %v489_v58, %v3464_v38 }
 0x41f   :  { %3006 = vtanh.f32 %v490_v60 }
 0x429   :  { %v3007_v61 = vpop.eup %3006 }
 0x42a   :  { %v492_v62 = vmul.f32 0.5, %v3007_v61 }
 0x42c   :  { %v493_v63 = vadd.f32 0.5, %v492_v62 }
 0x42e   :  { %v494_v0 = vsel %vm3458_vm4, %v3007_v61, %v493_v63  ;;  %v287_v63 = vadd.f32 %v3451_v31, %v3446_v29 }
 0x42f   :  { %497 = vrot.lane.b32.xlu0 %v494_v0, %s3250_s3  ;;  %v495_v3 = vmul.f32 %v494_v0, %v403_v51 }
 0x4a1   :  { %v498_v1 = vpop.permute.xlu0 %497 }
 0x4a2   :  { %v500_v2 = vmul.f32 %v498_v1, %v494_v0 }
 0x4a4   :  { %502 = vrot.lane.b32.xlu1 %v500_v2, %s3251_s22 }
 0x516   :  { %v503_v4 = vpop.permute.xlu1 %502 }
 0x517   :  { %v505_v5 = vadd.f32 %v503_v4, %v495_v3 }
 0x519   :  { %3008 = vtanh.f32 %v505_v5 }
 0x51a   :  { %3010 = vtanh.f32 %v155_v6 }
 0x51b   :  { %3012 = vtanh.f32 %v156_v7 }
 0x523   :  { %v3009_v8 = vpop.eup %3008 }
 0x524   :  { %v3011_v9 = vpop.eup %3010  ;;  %508 = vrot.lane.b32.xlu0 %v3009_v8, %s3250_s3 }
 0x525   :  { %v3013_v10 = vpop.eup %3012  ;;  %2578 = vmatprep.mubr.msk.f32.mxu0 %vm175_vm0, %v3011_v9 }
 0x526   :  { %2579 = vmatmul.mubr.msk.f32.gmra.mrb[2].mxu0 %vm175_vm0, %v3013_v10 }
 0x527   :  { %2617 = vmatprep.mubr.msk.f32.mxu0 %vm3247_vm1, %v3248_v25 }
 0x596   :  { %v509_v11 = vpop.permute.xlu0 %508 }
 0x597   :  { %v511_v12 = vmul.f32 %v509_v11, %v494_v0 }
 0x599   :  { %513 = vrot.lane.b32.xlu1 %v511_v12, %s3251_s22 }
 0x5f9   :  { %v2580_v13 = vpop.f32.mrb[2].mxu0 }
 0x5fa   :  { %v276_v16 = vpop.f32.mrb[3].mxu0  ;;  %v282_v45 = vadd.f32 %v2580_v13, %v3451_v31 }
 0x5fb   :  { %v277_v18 = vadd.f32 %v3451_v31, %v276_v16 }
 0x60b   :  { %v514_v17 = vpop.permute.xlu1 %513 }
 0x60c   :  { %517 = vst.msk [vmem:[#allocation3 + $0x8] sm:$0xff] %vm175_vm0, %v514_v17  ;;  %2618 = vmatmul.mubr.msk.f32.vlgmr.msra.gmra.mrb[4].mxu0 %vm175_vm0, %v514_v17 }
 0x60d   :  { %2861 = vmatpush3.bf16.msra.mxu0 %v3417_v15  ;;  %2639 = vmatprep.mubr.msk.f32.mxu0 %vm3247_vm1, %v3248_v25 }
 0x60e   :  { %2862 = vmatprep.subr.bf16.mxu0 %v3246_v14 }
 0x611   :  { %2864 = vmatpush3.bf16.msra.mxu0 %v3423_v22 }
 0x612   :  { %2871 = vmatprep.subr.bf16.mxu0 %v3246_v14 }
 0x6df   :  { %v588_v19 = vpop.f32.mrb[4].mxu0 }
 0x6e0   :  { %v592_v20 = vadd.f32 %v588_v19, %v277_v18  ;;  %v2619_v21 = vpop.f32.mrb[5].mxu0  ;;  %v292_v18 = vadd.f32 %v3444_v28, %v3451_v31 }
 0x6e2   :  { %v593_v23 = vmul.f32 %v592_v20, %v3464_v38 }
 0x6e4   :  { %3014 = vtanh.f32 %v593_v23 }
 0x6ee   :  { %v3015_v24 = vpop.eup %3014 }
 0x6ef   :  { %v595_v26 = vmul.f32 0.5, %v3015_v24 }
 0x6f1   :  { %v596_v27 = vadd.f32 0.5, %v595_v26 }
 0x6f3   :  { %v597_v30 = vsel %vm3458_vm4, %v3015_v24, %v596_v27 }
 0x6f4   :  { %600 = vrot.lane.b32.xlu0 %v597_v30, %s3250_s3  ;;  %v598_v37 = vmul.f32 %v597_v30, %v505_v5 }
 0x766   :  { %v601_v33 = vpop.permute.xlu0 %600 }
 0x767   :  { %v603_v34 = vmul.f32 %v601_v33, %v597_v30 }
 0x769   :  { %605 = vrot.lane.b32.xlu1 %v603_v34, %s3251_s22 }
 0x7db   :  { %v606_v39 = vpop.permute.xlu1 %605 }
 0x7dc   :  { %v608_v40 = vadd.f32 %v606_v39, %v598_v37 }
 0x7de   :  { %3016 = vtanh.f32 %v608_v40 }
 0x7e8   :  { %v3017_v41 = vpop.eup %3016 }
 0x7e9   :  { %611 = vrot.lane.b32.xlu0 %v3017_v41, %s3250_s3 }
 0x85b   :  { %v612_v42 = vpop.permute.xlu0 %611 }
 0x85c   :  { %v614_v43 = vmul.f32 %v612_v42, %v597_v30  ;;  %v297_v42 = vadd.f32 %v3451_v31, %v3456_v35 }
 0x85e   :  { %616 = vrot.lane.b32.xlu1 %v614_v43, %s3251_s22 }
 0x8d0   :  { %v617_v44 = vpop.permute.xlu1 %616 }
 0x8d1   :  { %620 = vst.msk [vmem:[#allocation3 + $0x10] sm:$0xff] %vm175_vm0, %v617_v44  ;;  %2629 = vmatmul.mubr.msk.f32.vlgmr.msra.gmra.mrb[8].mxu1 %vm175_vm0, %v617_v44 }
 0x8d2   :  { %2867 = vmatpush3.bf16.msra.mxu1 %v3417_v15  ;;  %2650 = vmatprep.mubr.msk.f32.mxu1 %vm3247_vm1, %v3248_v25 }
 0x8d3   :  { %2868 = vmatprep.subr.bf16.mxu1 %v3246_v14 }
 0x8d6   :  { %2870 = vmatpush3.bf16.msra.mxu1 %v3423_v22 }
 0x8d7   :  { %2877 = vmatprep.subr.bf16.mxu1 %v3246_v14 }
 0x9a4   :  { %v691_v46 = vpop.f32.mrb[8].mxu1 }
 0x9a5   :  { %v695_v47 = vadd.f32 %v691_v46, %v282_v45  ;;  %v2630_v48 = vpop.f32.mrb[9].mxu1 }
 0x9a7   :  { %v696_v49 = vmul.f32 %v695_v47, %v3464_v38 }
 0x9a9   :  { %3018 = vtanh.f32 %v696_v49 }
 0x9b3   :  { %v3019_v50 = vpop.eup %3018 }
 0x9b4   :  { %v698_v51 = vmul.f32 0.5, %v3019_v50 }
 0x9b6   :  { %v699_v52 = vadd.f32 0.5, %v698_v51 }
 0x9b8   :  { %v700_v53 = vsel %vm3458_vm4, %v3019_v50, %v699_v52 }
 0x9b9   :  { %703 = vrot.lane.b32.xlu0 %v700_v53, %s3250_s3  ;;  %v701_v56 = vmul.f32 %v700_v53, %v608_v40 }
 0xa2b   :  { %v704_v54 = vpop.permute.xlu0 %703 }
 0xa2c   :  { %v706_v55 = vmul.f32 %v704_v54, %v700_v53 }
 0xa2e   :  { %708 = vrot.lane.b32.xlu1 %v706_v55, %s3251_s22  ;;  %v1288_v55 = vld [vmem:[#allocation10] sm:$0xff] }
 0xaa0   :  { %v709_v57 = vpop.permute.xlu1 %708 }
 0xaa1   :  { %v711_v58 = vadd.f32 %v709_v57, %v701_v56  ;;  %v1289_v56 = vld [vmem:[#allocation10 + $0x8] sm:$0xff] }
 0xaa2   :  { %v2895_v57 = vpack.c.bf16 %v1289_v56, %v1288_v55  ;;  %v3635_v56 = vld [vmem:[%s3785_s6] ss:$0 sm:$0xff] }
 0xaa3   :  { %3020 = vtanh.f32 %v711_v58 }
 0xaad   :  { %v3021_v59 = vpop.eup %3020 }
 0xaae   :  { %714 = vrot.lane.b32.xlu0 %v3021_v59, %s3250_s3 }
 0xb20   :  { %v715_v60 = vpop.permute.xlu0 %714 }
 0xb21   :  { %v717_v61 = vmul.f32 %v715_v60, %v700_v53 }
 0xb23   :  { %719 = vrot.lane.b32.xlu1 %v717_v61, %s3251_s22  ;;  %v1290_v61 = vld [vmem:[#allocation10 + $0x10] sm:$0xff] }
 0xb95   :  { %v720_v62 = vpop.permute.xlu1 %719 }
 0xb96   :  { %723 = vst.msk [vmem:[#allocation3 + $0x18] sm:$0xff] %vm175_vm0, %v720_v62  ;;  %2640 = vmatmul.mubr.msk.f32.vlgmr.msra.gmra.mrb[6].mxu0 %vm175_vm0, %v720_v62  ;;  %v1291_v62 = vld [vmem:[#allocation10 + $0x18] sm:$0xff] }
 0xb97   :  { %2873 = vmatpush3.bf16.msra.mxu0 %v3417_v15  ;;  %2661 = vmatprep.mubr.msk.f32.mxu0 %vm3247_vm1, %v3248_v25 }
 0xb98   :  { %2874 = vmatprep.subr.bf16.mxu0 %v3246_v14 }
 0xb9b   :  { %2876 = vmatpush3.bf16.msra.mxu0 %v3423_v22 }
 0xb9c   :  { %2883 = vmatprep.subr.bf16.mxu0 %v3246_v14 }
 0xc69   :  { %v794_v0 = vpop.f32.mrb[6].mxu0 }
 0xc6a   :  { %v798_v1 = vadd.f32 %v794_v0, %v287_v63  ;;  %v2641_v2 = vpop.f32.mrb[7].mxu0  ;;  %v2899_v63 = vpack.c.bf16 %v1291_v62, %v1290_v61 }
 0xc6b   :  { %v1298_v2 = vld [vmem:[#allocation3 + $0x8] sm:$0xff] }
 0xc6c   :  { %v799_v3 = vmul.f32 %v798_v1, %v3464_v38  ;;  %v1297_v1 = vld [vmem:[#allocation3] sm:$0xff] }
 0xc6e   :  { %3022 = vtanh.f32 %v799_v3  ;;  %v1299_v3 = vld [vmem:[#allocation3 + $0x10] sm:$0xff] }
 0xc78   :  { %v3023_v4 = vpop.eup %3022 }
 0xc79   :  { %v801_v5 = vmul.f32 0.5, %v3023_v4 }
 0xc7b   :  { %v802_v6 = vadd.f32 0.5, %v801_v5 }
 0xc7d   :  { %v803_v7 = vsel %vm3458_vm4, %v3023_v4, %v802_v6  ;;  %v1300_v4 = vld [vmem:[#allocation3 + $0x18] sm:$0xff] }
 0xc7e   :  { %806 = vrot.lane.b32.xlu0 %v803_v7, %s3250_s3  ;;  %v804_v10 = vmul.f32 %v803_v7, %v711_v58 }
 0xcf0   :  { %v807_v8 = vpop.permute.xlu0 %806 }
 0xcf1   :  { %v809_v9 = vmul.f32 %v807_v8, %v803_v7  ;;  %v302_v8 = vadd.f32 %v3453_v32, %v3451_v31 }
 0xcf3   :  { %811 = vrot.lane.b32.xlu1 %v809_v9, %s3251_s22 }
 0xd65   :  { %v812_v29 = vpop.permute.xlu1 %811 }
 0xd66   :  { %v814_v11 = vadd.f32 %v812_v29, %v804_v10 }
 0xd68   :  { %3024 = vtanh.f32 %v814_v11 }
 0xd72   :  { %v3025_v12 = vpop.eup %3024 }
 0xd73   :  { %817 = vrot.lane.b32.xlu0 %v3025_v12, %s3250_s3 }
 0xde5   :  { %v818_v13 = vpop.permute.xlu0 %817 }
 0xde6   :  { %v820_v16 = vmul.f32 %v818_v13, %v803_v7 }
 0xde8   :  { %822 = vrot.lane.b32.xlu1 %v820_v16, %s3251_s22 }
 0xe5a   :  { %v823_v17 = vpop.permute.xlu1 %822 }
 0xe5b   :  { %826 = vst.msk [vmem:[#allocation3 + $0x20] sm:$0xff] %vm175_vm0, %v823_v17  ;;  %2651 = vmatmul.mubr.msk.f32.vlgmr.msra.gmra.mrb[10].mxu1 %vm175_vm0, %v823_v17 }
 0xe5c   :  { %2879 = vmatpush3.bf16.msra.mxu1 %v3417_v15  ;;  %2672 = vmatprep.mubr.msk.f32.mxu1 %vm3247_vm1, %v3248_v25 }
 0xe5d   :  { %2880 = vmatprep.subr.bf16.mxu1 %v3246_v14 }
 0xe60   :  { %2882 = vmatpush3.bf16.msra.mxu1 %v3423_v22 }
 0xe61   :  { %2896 = vmatprep.subr.bf16.mxu1 %v2895_v57 }
 0xe62   :  { %v1301_v5 = vld [vmem:[#allocation3 + $0x20] sm:$0xff] }
 0xf2e   :  { %v897_v19 = vpop.f32.mrb[10].mxu1 }
 0xf2f   :  { %v901_v20 = vadd.f32 %v897_v19, %v292_v18  ;;  %v2652_v21 = vpop.f32.mrb[11].mxu1 }
 0xf31   :  { %v902_v23 = vmul.f32 %v901_v20, %v3464_v38 }
 0xf33   :  { %3026 = vtanh.f32 %v902_v23 }
 0xf3d   :  { %v3027_v24 = vpop.eup %3026 }
 0xf3e   :  { %v904_v26 = vmul.f32 0.5, %v3027_v24 }
 0xf40   :  { %v905_v27 = vadd.f32 0.5, %v904_v26 }
 0xf42   :  { %v906_v15 = vsel %vm3458_vm4, %v3027_v24, %v905_v27 }
 0xf43   :  { %909 = vrot.lane.b32.xlu0 %v906_v15, %s3250_s3  ;;  %v907_v22 = vmul.f32 %v906_v15, %v814_v11 }
 0xfb5   :  { %v910_v30 = vpop.permute.xlu0 %909 }
 0xfb6   :  { %v912_v33 = vmul.f32 %v910_v30, %v906_v15 }
 0xfb8   :  { %914 = vrot.lane.b32.xlu1 %v912_v33, %s3251_s22  ;;  %v121_v33 = vld [vmem:[#allocation13] sm:$0xff] }
0x102a   :  { %v915_v28 = vpop.permute.xlu1 %914 }
0x102b   :  { %v917_v34 = vadd.f32 %v915_v28, %v907_v22  ;;  %v122_v22 = vld [vmem:[#allocation13 + $0x8] sm:$0xff]  ;;  %v123_v28 = vld [vmem:[#allocation13 + $0x10] sm:$0xff] }
0x102d   :  { %3028 = vtanh.f32 %v917_v34 }
0x1037   :  { %v3029_v37 = vpop.eup %3028 }
0x1038   :  { %920 = vrot.lane.b32.xlu0 %v3029_v37, %s3250_s3  ;;  %v124_v37 = vld [vmem:[#allocation13 + $0x18] sm:$0xff] }
0x10aa   :  { %v921_v39 = vpop.permute.xlu0 %920 }
0x10ab   :  { %v923_v40 = vmul.f32 %v921_v39, %v906_v15  ;;  %v2887_v39 = vpack.c.bf16 %v124_v37, %v123_v28 }
0x10ad   :  { %925 = vrot.lane.b32.xlu1 %v923_v40, %s3251_s22 }
0x111f   :  { %v926_v41 = vpop.permute.xlu1 %925 }
0x1120   :  { %929 = vst.msk [vmem:[#allocation3 + $0x28] sm:$0xff] %vm175_vm0, %v926_v41  ;;  %2662 = vmatmul.mubr.msk.f32.vlgmr.msra.gmra.mrb[8].mxu0 %vm175_vm0, %v926_v41 }
0x1121   :  { %2683 = vmatprep.mubr.msk.f32.mxu0 %vm3247_vm1, %v3248_v25 }
0x1127   :  { %v1302_v6 = vld [vmem:[#allocation3 + $0x28] sm:$0xff] }
0x11f3   :  { %v1000_v43 = vpop.f32.mrb[8].mxu0 }
0x11f4   :  { %v1004_v44 = vadd.f32 %v1000_v43, %v297_v42  ;;  %v2663_v45 = vpop.f32.mrb[9].mxu0  ;;  %v1292_v42 = vld [vmem:[#allocation12] sm:$0xff]  ;;  %v1293_v43 = vld [vmem:[#allocation12 + $0x8] sm:$0xff] }
0x11f5   :  { %v1294_v45 = vld [vmem:[#allocation12 + $0x10] sm:$0xff] }
0x11f6   :  { %v1005_v46 = vmul.f32 %v1004_v44, %v3464_v38  ;;  %v3604_v44 = vpack.c.bf16 %v1293_v43, %v1292_v42 }
0x11f8   :  { %3030 = vtanh.f32 %v1005_v46  ;;  %v1295_v46 = vld [vmem:[#allocation12 + $0x18] sm:$0xff] }
0x1202   :  { %v3031_v47 = vpop.eup %3030 }
0x1203   :  { %v1007_v48 = vmul.f32 0.5, %v3031_v47 }
0x1205   :  { %v1008_v49 = vadd.f32 0.5, %v1007_v48 }
0x1207   :  { %v1009_v50 = vsel %vm3458_vm4, %v3031_v47, %v1008_v49  ;;  %v3608_v47 = vpack.c.bf16 %v1295_v46, %v1294_v45  ;;  %v125_v49 = vld [vmem:[#allocation13 + $0x20] sm:$0xff] }
0x1208   :  { %1012 = vrot.lane.b32.xlu0 %v1009_v50, %s3250_s3  ;;  %v1010_v53 = vmul.f32 %v1009_v50, %v917_v34  ;;  %v2884_v34 = vpack.c.bf16 %v122_v22, %v121_v33 }
0x120a   :  { %2885 = vmatpush3.bf16.msra.mxu0 %v2884_v34 }
0x120b   :  { %2886 = vmatprep.subr.bf16.mxu0 %v3246_v14 }
0x120e   :  { %2888 = vmatpush3.bf16.msra.mxu0 %v2887_v39 }
0x120f   :  { %2889 = vmatprep.subr.bf16.mxu0 %v3246_v14 }
0x127a   :  { %v1013_v51 = vpop.permute.xlu0 %1012 }
0x127b   :  { %v1015_v52 = vmul.f32 %v1013_v51, %v1009_v50 }
0x127d   :  { %1017 = vrot.lane.b32.xlu1 %v1015_v52, %s3251_s22  ;;  %v127_v52 = vld [vmem:[#allocation13 + $0x30] sm:$0xff] }
0x12ef   :  { %v1018_v35 = vpop.permute.xlu1 %1017 }
0x12f0   :  { %v1020_v54 = vadd.f32 %v1018_v35, %v1010_v53  ;;  %v128_v53 = vld [vmem:[#allocation13 + $0x38] sm:$0xff] }
0x12f2   :  { %3032 = vtanh.f32 %v1020_v54 }
0x12fc   :  { %v3033_v58 = vpop.eup %3032 }
0x12fd   :  { %1023 = vrot.lane.b32.xlu0 %v3033_v58, %s3250_s3 }
0x136f   :  { %v1024_v59 = vpop.permute.xlu0 %1023 }
0x1370   :  { %v1026_v60 = vmul.f32 %v1024_v59, %v1009_v50  ;;  %v126_v50 = vld [vmem:[#allocation13 + $0x28] sm:$0xff] }
0x1371   :  { %v2890_v51 = vpack.c.bf16 %v126_v50, %v125_v49 }
0x1372   :  { %1028 = vrot.lane.b32.xlu1 %v1026_v60, %s3251_s22 }
0x13e4   :  { %v1029_v0 = vpop.permute.xlu1 %1028 }
0x13e5   :  { %1032 = vst.msk [vmem:[#allocation3 + $0x30] sm:$0xff] %vm175_vm0, %v1029_v0  ;;  %2673 = vmatmul.mubr.msk.f32.vlgmr.msra.gmra.mrb[12].mxu1 %vm175_vm0, %v1029_v0 }
0x13e6   :  { %2898 = vmatpush3.bf16.msra.mxu1 %v2895_v57  ;;  %2705 = vmatprep.mubr.msk.f32.mxu1 %vm175_vm0, %v1297_v1 }
0x13e7   :  { %2900 = vmatprep.subr.bf16.mxu1 %v2899_v63 }
0x13ea   :  { %2902 = vmatpush3.bf16.msra.mxu1 %v2899_v63 }
0x13eb   :  { %2909 = vmatprep.subr.bf16.mxu1 %v3246_v14 }
0x13ec   :  { %v1303_v7 = vld [vmem:[#allocation3 + $0x30] sm:$0xff] }
0x13ed   :  { %2706 = vmatmul.mubr.msk.f32.vlgmr.msra.gmra.mrb[14].mxu1 %vm175_vm0, %v1298_v2 }
0x13ee   :  { %2708 = vmatprep.mubr.msk.f32.mxu1 %vm175_vm0, %v1299_v3  ;;  %2911 = vmatpush3.bf16.msra.mxu1 %v3604_v44 }
0x13ef   :  { %2912 = vmatprep.subr.bf16.mxu1 %v3246_v14 }
0x13f1   :  { %2709 = vmatmul.mubr.msk.f32.gmra.mrb[16].mxu1 %vm175_vm0, %v1300_v4 }
0x13f2   :  { %2711 = vmatprep.mubr.msk.f32.mxu1 %vm175_vm0, %v1301_v5  ;;  %2914 = vmatpush3.bf16.msra.mxu1 %v3608_v47 }
0x13f3   :  { %2921 = vmatprep.subr.bf16.mxu1 %v3246_v14 }
0x13f5   :  { %2712 = vmatmul.mubr.msk.f32.gmra.mrb[18].mxu1 %vm175_vm0, %v1302_v6 }
0x13f6   :  { %2714 = vmatprep.mubr.msk.f32.mxu1 %vm175_vm0, %v1303_v7 }
0x14b8   :  { %v1103_v9 = vpop.f32.mrb[12].mxu1 }
0x14b9   :  { %v1107_v10 = vadd.f32 %v1103_v9, %v302_v8  ;;  %v2674_v29 = vpop.f32.mrb[13].mxu1 }
0x14bb   :  { %v1108_v11 = vmul.f32 %v1107_v10, %v3464_v38 }
0x14bd   :  { %3034 = vtanh.f32 %v1108_v11 }
0x14c0   :  { %v3584_v12 = vpop.f32.mrb[14].mxu1 }
0x14c1   :  { %v3586_v13 = vpop.f32.mrb[15].mxu1 }
0x14c2   :  { %v1402_v57 = vadd.f32 %v3635_v56, %v3586_v13 }
0x14c4   :  { %v3588_v16 = vpop.f32.mrb[16].mxu1 }
0x14c5   :  { %v3590_v17 = vpop.f32.mrb[17].mxu1 }
0x14c6   :  { %v1412_v42 = vadd.f32 %v3635_v56, %v3590_v17 }
0x14c7   :  { %v3035_v18 = vpop.eup %3034 }
0x14c8   :  { %v3592_v19 = vpop.f32.mrb[18].mxu1  ;;  %v1110_v20 = vmul.f32 0.5, %v3035_v18 }
0x14c9   :  { %v3594_v21 = vpop.f32.mrb[19].mxu1 }
0x14ca   :  { %v1111_v31 = vadd.f32 0.5, %v1110_v20  ;;  %v1407_v20 = vadd.f32 %v3584_v12, %v3635_v56 }
0x14cc   :  { %v1112_v32 = vsel %vm3458_vm4, %v3035_v18, %v1111_v31 }
0x14cd   :  { %1115 = vrot.lane.b32.xlu0 %v1112_v32, %s3250_s3  ;;  %v1113_v26 = vmul.f32 %v1112_v32, %v1020_v54  ;;  %v2893_v54 = vpack.c.bf16 %v128_v53, %v127_v52 }
0x153f   :  { %v1116_v23 = vpop.permute.xlu0 %1115 }
0x1540   :  { %v1118_v24 = vmul.f32 %v1116_v23, %v1112_v32 }
0x1542   :  { %1120 = vrot.lane.b32.xlu1 %v1118_v24, %s3251_s22 }
0x15b4   :  { %v1121_v27 = vpop.permute.xlu1 %1120 }
0x15b5   :  { %v1123_v15 = vadd.f32 %v1121_v27, %v1113_v26 }
0x15b7   :  { %3036 = vtanh.f32 %v1123_v15 }
0x15c1   :  { %v3037_v30 = vpop.eup %3036 }
0x15c2   :  { %1126 = vrot.lane.b32.xlu0 %v3037_v30, %s3250_s3 }
0x15c6   :  { %1213 = vrot.lane.b32.xlu0 %v3037_v30, %s3252_s16 }
0x1634   :  { %v1127_v40 = vpop.permute.xlu0 %1126 }
0x1635   :  { %v1129_v41 = vmul.f32 %v1127_v40, %v1112_v32 }
0x1637   :  { %3038 = vtanh.f32 %v1129_v41 }
0x1638   :  { %v1214_v55 = vpop.permute.xlu0 %1213 }
0x1641   :  { %v3039_v48 = vpop.eup %3038 }
0x1642   :  { %1138 = vrot.lane.b32.xlu1 %v3039_v48, %s3251_s22 }
0x16b4   :  { %v1139_v35 = vpop.permute.xlu1 %1138 }
0x16b5   :  { %2684 = vmatmul.mubr.msk.f32.vlgmr.msra.gmra.mrb[10].mxu0 %vm175_vm0, %v1139_v35 }
0x16b6   :  { %2891 = vmatpush3.bf16.msra.mxu0 %v2890_v51  ;;  %2694 = vmatprep.mubr.msk.f32.mxu0 %vm3247_vm1, %v3248_v25 }
0x16b7   :  { %2892 = vmatprep.subr.bf16.mxu0 %v3246_v14 }
0x16ba   :  { %2894 = vmatpush3.bf16.msra.mxu0 %v2893_v54 }
0x16bb   :  { %2903 = vmatprep.subr.bf16.mxu0 %v3246_v14 }
0x16bd   :  { %2695 = vmatmul.mubr.msk.f32.vlgmr.msra.gmra.mrb[10].mxu0 %vm175_vm0, %v1214_v55 }
0x16be   :  { %2905 = vmatpush3.bf16.msra.mxu0 %v3604_v44  ;;  %2725 = vmatprep.mubr.msk.f32.mxu0 %vm3247_vm1, %v3248_v25 }
0x16bf   :  { %2906 = vmatprep.subr.bf16.mxu0 %v3246_v14 }
0x16c2   :  { %2908 = vmatpush3.bf16.msra.mxu0 %v3608_v47 }
0x16c3   :  { %2915 = vmatprep.subr.bf16.mxu0 %v3246_v14 }
0x16c5   :  { %2726 = vmatmul.mubr.f32.vlgmr.msra.gmra.mrb[12].mxu0 %v3248_v25 }
0x16c6   :  { %2917 = vmatpush3.bf16.msra.mxu0 %v3604_v44  ;;  %2747 = vmatprep.mubr.msk.f32.mxu0 %vm3247_vm1, %v3248_v25 }
0x16c7   :  { %2918 = vmatprep.subr.bf16.mxu0 %v3246_v14 }
0x16ca   :  { %2920 = vmatpush3.bf16.msra.mxu0 %v3608_v47 }
0x16cb   :  { %2927 = vmatprep.subr.bf16.mxu0 %v3246_v14 }
0x1798   :  { %v1515_v58 = vpop.f32.mrb[12].mxu0 }
0x1799   :  { %v1519_v59 = vadd.f32 %v1515_v58, %v1402_v57  ;;  %v2727_v60 = vpop.f32.mrb[13].mxu0 }
0x179b   :  { %v1520_v61 = vmul.f32 %v1519_v59, %v3464_v38 }
0x179d   :  { %3040 = vtanh.f32 %v1520_v61  ;;  %v1417_v61 = vadd.f32 %v3588_v16, %v3635_v56 }
0x17a7   :  { %v3041_v62 = vpop.eup %3040 }
0x17a8   :  { %v1522_v63 = vmul.f32 0.5, %v3041_v62 }
0x17aa   :  { %v1523_v0 = vadd.f32 0.5, %v1522_v63 }
0x17ac   :  { %v1524_v1 = vsel %vm3458_vm4, %v3041_v62, %v1523_v0 }
0x17ad   :  { %1527 = vrot.lane.b32.xlu1 %v1524_v1, %s3250_s3  ;;  %v1525_v4 = vmul.f32 0.0, %v1524_v1 }
0x181f   :  { %v1528_v2 = vpop.permute.xlu1 %1527 }
0x1820   :  { %v1530_v3 = vmul.f32 %v1528_v2, %v1524_v1 }
0x1822   :  { %1532 = vrot.lane.b32.xlu0 %v1530_v3, %s3251_s22 }
0x1826   :  { %1131 = vrot.lane.b32.xlu0 %v1129_v41, %s3251_s22 }
0x1894   :  { %v1533_v5 = vpop.permute.xlu0 %1532 }
0x1895   :  { %v1535_v6 = vadd.f32 %v1533_v5, %v1525_v4 }
0x1897   :  { %3042 = vtanh.f32 %v1535_v6 }
0x1898   :  { %v1132_v7 = vpop.permute.xlu0 %1131 }
0x1899   :  { %1135 = vst.msk [vmem:[#allocation3 + $0x38] sm:$0xff] %vm175_vm0, %v1132_v7 }
0x18a0   :  { %v1304_v8 = vld [vmem:[#allocation3 + $0x38] sm:$0xff] }
0x18a1   :  { %v3043_v9 = vpop.eup %3042  ;;  %2715 = vmatmul.mubr.msk.f32.gmra.mrb[20].mxu1 %vm175_vm0, %v1304_v8 }
0x18a2   :  { %1538 = vrot.lane.b32.xlu1 %v3043_v9, %s3250_s3  ;;  %2736 = vmatprep.mubr.msk.f32.mxu1 %vm3247_vm1, %v3248_v25 }
0x1914   :  { %v1539_v10 = vpop.permute.xlu1 %1538 }
0x1915   :  { %v1541_v29 = vmul.f32 %v1539_v10, %v1524_v1 }
0x1917   :  { %1544 = vrot.lane.b32.xlu1 %v1541_v29, %s3251_s22 }
0x1974   :  { %v3651_v11 = vpop.f32.mrb[20].mxu1 }
0x1975   :  { %v3653_v13 = vpop.f32.mrb[21].mxu1 }
0x1989   :  { %v1545_v18 = vpop.permute.xlu1 %1544 }
0x198a   :  { %2737 = vmatmul.mubr.msk.f32.vlgmr.msra.gmra.mrb[22].mxu1 %vm175_vm0, %v1545_v18 }
0x198b   :  { %2923 = vmatpush3.bf16.msra.mxu1 %v3604_v44  ;;  %2758 = vmatprep.mubr.msk.f32.mxu1 %vm3247_vm1, %v3248_v25 }
0x198c   :  { %2924 = vmatprep.subr.bf16.mxu1 %v3246_v14 }
0x198f   :  { %2926 = vmatpush3.bf16.msra.mxu1 %v3608_v47 }
0x1990   :  { %2933 = vmatprep.subr.bf16.mxu1 %v3246_v14 }
0x1a5d   :  { %v1614_v31 = vpop.f32.mrb[22].mxu1 }
0x1a5e   :  { %v1618_v32 = vadd.f32 %v1614_v31, %v1407_v20  ;;  %v2738_v23 = vpop.f32.mrb[23].mxu1  ;;  %v1422_v31 = vadd.f32 %v3635_v56, %v3594_v21 }
0x1a60   :  { %v1619_v24 = vmul.f32 %v1618_v32, %v3464_v38 }
0x1a62   :  { %3044 = vtanh.f32 %v1619_v24 }
0x1a6c   :  { %v3045_v26 = vpop.eup %3044 }
0x1a6d   :  { %v1621_v27 = vmul.f32 0.5, %v3045_v26 }
0x1a6f   :  { %v1622_v15 = vadd.f32 0.5, %v1621_v27 }
0x1a71   :  { %v1623_v30 = vsel %vm3458_vm4, %v3045_v26, %v1622_v15 }
0x1a72   :  { %1626 = vrot.lane.b32.xlu0 %v1623_v30, %s3250_s3  ;;  %v1624_v28 = vmul.f32 %v1623_v30, %v1535_v6 }
0x1ae4   :  { %v1627_v33 = vpop.permute.xlu0 %1626 }
0x1ae5   :  { %v1629_v22 = vmul.f32 %v1627_v33, %v1623_v30 }
0x1ae7   :  { %1631 = vrot.lane.b32.xlu1 %v1629_v22, %s3251_s22 }
0x1b59   :  { %v1632_v12 = vpop.permute.xlu1 %1631 }
0x1b5a   :  { %v1634_v34 = vadd.f32 %v1632_v12, %v1624_v28 }
0x1b5c   :  { %3046 = vtanh.f32 %v1634_v34 }
0x1b66   :  { %v3047_v37 = vpop.eup %3046 }
0x1b67   :  { %1637 = vrot.lane.b32.xlu0 %v3047_v37, %s3250_s3 }
0x1bd9   :  { %v1638_v39 = vpop.permute.xlu0 %1637 }
0x1bda   :  { %v1640_v40 = vmul.f32 %v1638_v39, %v1623_v30 }
0x1bdc   :  { %1643 = vrot.lane.b32.xlu1 %v1640_v40, %s3251_s22 }
0x1c4e   :  { %v1644_v41 = vpop.permute.xlu1 %1643 }
0x1c4f   :  { %2748 = vmatmul.mubr.msk.f32.vlgmr.msra.gmra.mrb[14].mxu0 %vm175_vm0, %v1644_v41 }
0x1c50   :  { %2929 = vmatpush3.bf16.msra.mxu0 %v3604_v44  ;;  %2769 = vmatprep.mubr.msk.f32.mxu0 %vm3247_vm1, %v3248_v25 }
0x1c51   :  { %2930 = vmatprep.subr.bf16.mxu0 %v3246_v14 }
0x1c54   :  { %2932 = vmatpush3.bf16.msra.mxu0 %v3608_v47 }
0x1c55   :  { %2939 = vmatprep.subr.bf16.mxu0 %v3246_v14 }
0x1d22   :  { %v1713_v43 = vpop.f32.mrb[14].mxu0 }
0x1d23   :  { %v1717_v45 = vadd.f32 %v1713_v43, %v1412_v42  ;;  %v2749_v46 = vpop.f32.mrb[15].mxu0  ;;  %v1427_v42 = vadd.f32 %v3592_v19, %v3635_v56 }
0x1d25   :  { %v1718_v48 = vmul.f32 %v1717_v45, %v3464_v38 }
0x1d27   :  { %3048 = vtanh.f32 %v1718_v48 }
0x1d31   :  { %v3049_v49 = vpop.eup %3048 }
0x1d32   :  { %v1720_v50 = vmul.f32 0.5, %v3049_v49 }
0x1d34   :  { %v1721_v51 = vadd.f32 0.5, %v1720_v50 }
0x1d36   :  { %v1722_v52 = vsel %vm3458_vm4, %v3049_v49, %v1721_v51 }
0x1d37   :  { %1725 = vrot.lane.b32.xlu0 %v1722_v52, %s3250_s3  ;;  %v1723_v54 = vmul.f32 %v1722_v52, %v1634_v34 }
0x1da9   :  { %v1726_v53 = vpop.permute.xlu0 %1725 }
0x1daa   :  { %v1728_v35 = vmul.f32 %v1726_v53, %v1722_v52 }
0x1dac   :  { %1730 = vrot.lane.b32.xlu1 %v1728_v35, %s3251_s22 }
0x1e1e   :  { %v1731_v17 = vpop.permute.xlu1 %1730 }
0x1e1f   :  { %v1733_v55 = vadd.f32 %v1731_v17, %v1723_v54 }
0x1e21   :  { %3050 = vtanh.f32 %v1733_v55 }
0x1e2b   :  { %v3051_v57 = vpop.eup %3050 }
0x1e2c   :  { %1736 = vrot.lane.b32.xlu0 %v3051_v57, %s3250_s3 }
0x1e9e   :  { %v1737_v58 = vpop.permute.xlu0 %1736 }
0x1e9f   :  { %v1739_v59 = vmul.f32 %v1737_v58, %v1722_v52  ;;  %v1432_v58 = vadd.f32 %v3635_v56, %v3653_v13 }
0x1ea1   :  { %1742 = vrot.lane.b32.xlu1 %v1739_v59, %s3251_s22 }
0x1f13   :  { %v1743_v60 = vpop.permute.xlu1 %1742 }
0x1f14   :  { %2759 = vmatmul.mubr.msk.f32.vlgmr.msra.gmra.mrb[24].mxu1 %vm175_vm0, %v1743_v60 }
0x1f15   :  { %2935 = vmatpush3.bf16.msra.mxu1 %v3604_v44  ;;  %2780 = vmatprep.mubr.msk.f32.mxu1 %vm3247_vm1, %v3248_v25 }
0x1f16   :  { %2936 = vmatprep.subr.bf16.mxu1 %v3246_v14 }
0x1f19   :  { %2938 = vmatpush3.bf16.msra.mxu1 %v3608_v47 }
0x1f1a   :  { %2945 = vmatprep.subr.bf16.mxu1 %v3246_v14 }
0x1fe7   :  { %v1812_v62 = vpop.f32.mrb[24].mxu1 }
0x1fe8   :  { %v1816_v63 = vadd.f32 %v1812_v62, %v1417_v61  ;;  %v2760_v0 = vpop.f32.mrb[25].mxu1 }
0x1fea   :  { %v1817_v1 = vmul.f32 %v1816_v63, %v3464_v38 }
0x1fec   :  { %3052 = vtanh.f32 %v1817_v1 }
0x1ff6   :  { %v3053_v2 = vpop.eup %3052 }
0x1ff7   :  { %v1819_v3 = vmul.f32 0.5, %v3053_v2 }
0x1ff9   :  { %v1820_v4 = vadd.f32 0.5, %v1819_v3 }
0x1ffb   :  { %v1821_v5 = vsel %vm3458_vm4, %v3053_v2, %v1820_v4 }
0x1ffc   :  { %1824 = vrot.lane.b32.xlu0 %v1821_v5, %s3250_s3  ;;  %v1822_v8 = vmul.f32 %v1821_v5, %v1733_v55 }
0x206e   :  { %v1825_v6 = vpop.permute.xlu0 %1824 }
0x206f   :  { %v1827_v7 = vmul.f32 %v1825_v6, %v1821_v5 }
0x2071   :  { %1829 = vrot.lane.b32.xlu1 %v1827_v7, %s3251_s22 }
0x20e3   :  { %v1830_v16 = vpop.permute.xlu1 %1829 }
0x20e4   :  { %v1832_v9 = vadd.f32 %v1830_v16, %v1822_v8 }
0x20e6   :  { %3054 = vtanh.f32 %v1832_v9 }
0x20f0   :  { %v3055_v10 = vpop.eup %3054 }
0x20f1   :  { %1835 = vrot.lane.b32.xlu0 %v3055_v10, %s3250_s3  ;;  %v1437_v10 = vadd.f32 %v3651_v11, %v3635_v56 }
0x2163   :  { %v1836_v29 = vpop.permute.xlu0 %1835 }
0x2164   :  { %v1838_v18 = vmul.f32 %v1836_v29, %v1821_v5 }
0x2166   :  { %1841 = vrot.lane.b32.xlu1 %v1838_v18, %s3251_s22 }
0x21d8   :  { %v1842_v20 = vpop.permute.xlu1 %1841 }
0x21d9   :  { %2770 = vmatmul.mubr.msk.f32.vlgmr.msra.gmra.mrb[16].mxu0 %vm175_vm0, %v1842_v20 }
0x21da   :  { %2941 = vmatpush3.bf16.msra.mxu0 %v3604_v44  ;;  %2791 = vmatprep.mubr.msk.f32.mxu0 %vm3247_vm1, %v3248_v25 }
0x21db   :  { %2942 = vmatprep.subr.bf16.mxu0 %v3246_v14 }
0x21de   :  { %2944 = vmatpush3.bf16.msra.mxu0 %v3608_v47 }
0x21df   :  { %2951 = vmatprep.subr.bf16.mxu0 %v3246_v14 }
0x22ac   :  { %v1911_v32 = vpop.f32.mrb[16].mxu0 }
0x22ad   :  { %v1915_v23 = vadd.f32 %v1911_v32, %v1422_v31  ;;  %v2771_v24 = vpop.f32.mrb[17].mxu0 }
0x22af   :  { %v1916_v26 = vmul.f32 %v1915_v23, %v3464_v38 }
0x22b1   :  { %3056 = vtanh.f32 %v1916_v26 }
0x22bb   :  { %v3057_v27 = vpop.eup %3056 }
0x22bc   :  { %v1918_v15 = vmul.f32 0.5, %v3057_v27 }
0x22be   :  { %v1919_v30 = vadd.f32 0.5, %v1918_v15 }
0x22c0   :  { %v1920_v33 = vsel %vm3458_vm4, %v3057_v27, %v1919_v30 }
0x22c1   :  { %1923 = vrot.lane.b32.xlu0 %v1920_v33, %s3250_s3  ;;  %v1921_v12 = vmul.f32 %v1920_v33, %v1832_v9 }
0x2333   :  { %v1924_v22 = vpop.permute.xlu0 %1923 }
0x2334   :  { %v1926_v28 = vmul.f32 %v1924_v22, %v1920_v33  ;;  %v130_v22 = vld [vmem:[#allocation13 + $0x48] sm:$0xff] }
0x2336   :  { %1928 = vrot.lane.b32.xlu1 %v1926_v28, %s3251_s22  ;;  %v131_v28 = vld [vmem:[#allocation13 + $0x50] sm:$0xff] }
0x23a8   :  { %v1929_v21 = vpop.permute.xlu1 %1928 }
0x23a9   :  { %v1931_v34 = vadd.f32 %v1929_v21, %v1921_v12  ;;  %v132_v21 = vld [vmem:[#allocation13 + $0x58] sm:$0xff] }
0x23aa   :  { %v2955_v36 = vpack.c.bf16 %v132_v21, %v131_v28 }
0x23ab   :  { %3058 = vtanh.f32 %v1931_v34 }
0x23b5   :  { %v3059_v37 = vpop.eup %3058 }
0x23b6   :  { %1934 = vrot.lane.b32.xlu0 %v3059_v37, %s3250_s3 }
0x2428   :  { %v1935_v39 = vpop.permute.xlu0 %1934 }
0x2429   :  { %v1937_v40 = vmul.f32 %v1935_v39, %v1920_v33 }
0x242b   :  { %1940 = vrot.lane.b32.xlu1 %v1937_v40, %s3251_s22  ;;  %v133_v40 = vld [vmem:[#allocation13 + $0x60] sm:$0xff] }
0x249d   :  { %v1941_v41 = vpop.permute.xlu1 %1940 }
0x249e   :  { %2781 = vmatmul.mubr.msk.f32.vlgmr.msra.gmra.mrb[26].mxu1 %vm175_vm0, %v1941_v41  ;;  %v134_v41 = vld [vmem:[#allocation13 + $0x68] sm:$0xff] }
0x249f   :  { %2947 = vmatpush3.bf16.msra.mxu1 %v3604_v44  ;;  %2802 = vmatprep.mubr.msk.f32.mxu1 %vm3247_vm1, %v3248_v25 }
0x24a0   :  { %2948 = vmatprep.subr.bf16.mxu1 %v3246_v14 }
0x24a3   :  { %2950 = vmatpush3.bf16.msra.mxu1 %v3608_v47 }
0x2571   :  { %v2010_v43 = vpop.f32.mrb[26].mxu1 }
0x2572   :  { %v2014_v45 = vadd.f32 %v2010_v43, %v1427_v42  ;;  %v2782_v46 = vpop.f32.mrb[27].mxu1  ;;  %v2958_v42 = vpack.c.bf16 %v134_v41, %v133_v40  ;;  %v135_v43 = vld [vmem:[#allocation13 + $0x70] sm:$0xff] }
0x2574   :  { %v2015_v48 = vmul.f32 %v2014_v45, %v3464_v38  ;;  %v136_v45 = vld [vmem:[#allocation13 + $0x78] sm:$0xff] }
0x2576   :  { %3060 = vtanh.f32 %v2015_v48  ;;  %v2961_v48 = vpack.c.bf16 %v136_v45, %v135_v43 }
0x2580   :  { %v3061_v49 = vpop.eup %3060 }
0x2581   :  { %v2017_v50 = vmul.f32 0.5, %v3061_v49 }
0x2583   :  { %v2018_v51 = vadd.f32 0.5, %v2017_v50  ;;  %v2406_v50 = vld [vmem:[%s3787_s8] ss:$0 sm:$0xff] }
0x2585   :  { %v2019_v44 = vsel %vm3458_vm4, %v3061_v49, %v2018_v51 }
0x2586   :  { %2022 = vrot.lane.b32.xlu0 %v2019_v44, %s3250_s3  ;;  %v2020_v47 = vmul.f32 %v2019_v44, %v1931_v34 }
0x25f8   :  { %v2023_v52 = vpop.permute.xlu0 %2022 }
0x25f9   :  { %v2025_v53 = vmul.f32 %v2023_v52, %v2019_v44 }
0x25fb   :  { %2027 = vrot.lane.b32.xlu1 %v2025_v53, %s3251_s22 }
0x266d   :  { %v2028_v19 = vpop.permute.xlu1 %2027 }
0x266e   :  { %v2030_v35 = vadd.f32 %v2028_v19, %v2020_v47 }
0x2670   :  { %3062 = vtanh.f32 %v2030_v35 }
0x267a   :  { %v3063_v54 = vpop.eup %3062 }
0x267b   :  { %2033 = vrot.lane.b32.xlu0 %v3063_v54, %s3250_s3 }
0x26ed   :  { %v2034_v17 = vpop.permute.xlu0 %2033 }
0x26ee   :  { %v2036_v55 = vmul.f32 %v2034_v17, %v2019_v44 }
0x26f0   :  { %2039 = vrot.lane.b32.xlu1 %v2036_v55, %s3251_s22 }
0x2762   :  { %v2040_v57 = vpop.permute.xlu1 %2039 }
0x2763   :  { %2792 = vmatmul.mubr.msk.f32.vlgmr.msra.gmra.mrb[18].mxu0 %vm175_vm0, %v2040_v57 }
0x2764   :  { %2813 = vmatprep.mubr.msk.f32.mxu0 %vm3247_vm1, %v3248_v25 }
0x2836   :  { %v2109_v59 = vpop.f32.mrb[18].mxu0 }
0x2837   :  { %v2113_v60 = vadd.f32 %v2109_v59, %v1432_v58  ;;  %v2793_v61 = vpop.f32.mrb[19].mxu0 }
0x2839   :  { %v2114_v62 = vmul.f32 %v2113_v60, %v3464_v38 }
0x283b   :  { %3064 = vtanh.f32 %v2114_v62 }
0x2845   :  { %v3065_v63 = vpop.eup %3064 }
0x2846   :  { %v2116_v0 = vmul.f32 0.5, %v3065_v63 }
0x2848   :  { %v2117_v1 = vadd.f32 0.5, %v2116_v0 }
0x284a   :  { %v2118_v2 = vsel %vm3458_vm4, %v3065_v63, %v2117_v1 }
0x284b   :  { %2121 = vrot.lane.b32.xlu0 %v2118_v2, %s3250_s3  ;;  %v2119_v5 = vmul.f32 %v2118_v2, %v2030_v35 }
0x28bd   :  { %v2122_v3 = vpop.permute.xlu0 %2121 }
0x28be   :  { %v2124_v4 = vmul.f32 %v2122_v3, %v2118_v2 }
0x28c0   :  { %2126 = vrot.lane.b32.xlu1 %v2124_v4, %s3251_s22 }
0x2932   :  { %v2127_v13 = vpop.permute.xlu1 %2126 }
0x2933   :  { %v2129_v6 = vadd.f32 %v2127_v13, %v2119_v5 }
0x2935   :  { %3066 = vtanh.f32 %v2129_v6 }
0x293f   :  { %v3067_v7 = vpop.eup %3066 }
0x2940   :  { %2132 = vrot.lane.b32.xlu0 %v3067_v7, %s3250_s3 }
0x29b2   :  { %v2133_v8 = vpop.permute.xlu0 %2132 }
0x29b3   :  { %v2135_v16 = vmul.f32 %v2133_v8, %v2118_v2 }
0x29b5   :  { %2138 = vrot.lane.b32.xlu1 %v2135_v16, %s3251_s22 }
0x2a27   :  { %v2139_v9 = vpop.permute.xlu1 %2138 }
0x2a28   :  { %2803 = vmatmul.mubr.msk.f32.vlgmr.msra.gmra.mrb[28].mxu1 %vm175_vm0, %v2139_v9 }
0x2afb   :  { %v2208_v29 = vpop.f32.mrb[28].mxu1 }
0x2afc   :  { %v2212_v18 = vadd.f32 %v2208_v29, %v1437_v10  ;;  %v2804_v20 = vpop.f32.mrb[29].mxu1 }
0x2afe   :  { %v2213_v31 = vmul.f32 %v2212_v18, %v3464_v38  ;;  %v129_v38 = vld [vmem:[#allocation13 + $0x40] sm:$0xff] }
0x2aff   :  { %v2952_v12 = vpack.c.bf16 %v130_v22, %v129_v38 }
0x2b00   :  { %3068 = vtanh.f32 %v2213_v31 }
0x2b01   :  { %2953 = vmatpush3.bf16.msra.mxu0 %v2952_v12 }
0x2b02   :  { %2954 = vmatprep.subr.bf16.mxu0 %v3246_v14 }
0x2b05   :  { %2956 = vmatpush3.bf16.msra.mxu0 %v2955_v36 }
0x2b06   :  { %2957 = vmatprep.subr.bf16.mxu0 %v3246_v14 }
0x2b0a   :  { %v3069_v32 = vpop.eup %3068 }
0x2b0b   :  { %v2215_v23 = vmul.f32 0.5, %v3069_v32 }
0x2b0d   :  { %v2216_v24 = vadd.f32 0.5, %v2215_v23 }
0x2b0f   :  { %v2217_v26 = vsel %vm3458_vm4, %v3069_v32, %v2216_v24 }
0x2b10   :  { %2220 = vrot.lane.b32.xlu0 %v2217_v26, %s3250_s3  ;;  %v2218_v30 = vmul.f32 %v2217_v26, %v2129_v6 }
0x2b82   :  { %v2221_v27 = vpop.permute.xlu0 %2220 }
0x2b83   :  { %v2223_v15 = vmul.f32 %v2221_v27, %v2217_v26 }
0x2b85   :  { %2225 = vrot.lane.b32.xlu1 %v2223_v15, %s3251_s22 }
0x2bf7   :  { %v2226_v56 = vpop.permute.xlu1 %2225 }
0x2bf8   :  { %v2228_v11 = vadd.f32 %v2226_v56, %v2218_v30 }
0x2bfa   :  { %3070 = vtanh.f32 %v2228_v11 }
0x2c04   :  { %v3071_v33 = vpop.eup %3070 }
0x2c05   :  { %2231 = vrot.lane.b32.xlu0 %v3071_v33, %s3250_s3 }
0x2c09   :  { %2312 = vrot.lane.b32.xlu0 %v3071_v33, %s3252_s16 }
0x2c77   :  { %v2232_v34 = vpop.permute.xlu0 %2231 }
0x2c78   :  { %v2234_v37 = vmul.f32 %v2232_v34, %v2217_v26 }
0x2c7a   :  { %3072 = vtanh.f32 %v2234_v37 }
0x2c7b   :  { %v2313_v49 = vpop.permute.xlu0 %2312 }
0x2c84   :  { %v3073_v39 = vpop.eup %3072 }
0x2c85   :  { %2237 = vrot.lane.b32.xlu1 %v3073_v39, %s3251_s22 }
0x2cf7   :  { %v2238_v46 = vpop.permute.xlu1 %2237 }
0x2cf8   :  { %2814 = vmatmul.mubr.msk.f32.vlgmr.msra.gmra.mrb[10].mxu0 %vm175_vm0, %v2238_v46 }
0x2cf9   :  { %2959 = vmatpush3.bf16.msra.mxu0 %v2958_v42  ;;  %2824 = vmatprep.mubr.msk.f32.mxu0 %vm3247_vm1, %v3248_v25 }
0x2cfa   :  { %2960 = vmatprep.subr.bf16.mxu0 %v3246_v14 }
0x2cfd   :  { %2962 = vmatpush3.bf16.msra.mxu0 %v2961_v48 }
0x2d00   :  { %2825 = vmatmul.mubr.msk.f32.vlgmr.msra.gmra.mrb[10].mxu0 %vm175_vm0, %v2313_v49 }
0x2dd3   :  { %v2382_v51 = vpop.f32.mrb[10].mxu0 }
0x2dd4   :  { %v2967_v44 = vadd.f32 %v2406_v50, %v2382_v51  ;;  %v2826_v52 = vpop.f32.mrb[11].mxu0 }
0x2dd6   :  { %2387 = vst [vmem:[#allocation15] sm:$0xff] %v2967_v44 }
0x2dd7   :  { %3217 = shalt.err (!%p3214_p10)
}
0x2dd8   :  { %s3218_s12 = scalar_lea.hbm %s3788_s9, 128 }
0x2dd9   :  { %p3219_p11 = scmp.ne.s32.totalorder %s3788_s9, %s3218_s12  ;;  %p3222_p12 = scmp.lt.u32.totalorder %s3218_s12, %s3788_s9 }
0x2ddb   :  { %p3224_p13 = pnand %p3222_p12, %p3219_p11 }
0x2ddd   :  { %3227 = shalt.err (!%p3224_p13)
}
0x2dde   :  { %2397 = dma.vmem_to_hbm [thread:$0]  %s2395_s24, 128, %s3788_s9, [#allocation6]  }
0x2ddf   :  { %3236 = dma.done.wait [#allocation6], 128  }
0x2de0   :  { %3237 = vsyncadd [#allocation6], 4294967168 }
0x2de1   :  { %2401 = vsyncpa [#allocation5], 1 }
0x2de2   :  { %2402 = vsyncpa [#allocation8], 1 }
0x2de3   :  { %2403 = vsyncpa [#allocation11], 1 }
0x2de4   :  { %2404 = vsyncpa [#allocation14], 1 }
0x2de5   :  { %2405 = vsyncpa [#allocation6], 1 }

</bundles_post_ra>
